<compile_context>
chip_gen: v7x
topology: tpu7x:2x2x1
jax: 0.10.0
libtpu: 0.0.40
codegen_flags: <defaults>
</compile_context>

<pallas_src>
import functools

import jax
import jax.numpy as jnp
from jax.experimental import pallas as pl
from jax.experimental.pallas import tpu as pltpu

LANE = 128


def _round_up(x, m):
    return (x + m - 1) // m * m


def _vmem_capacity_bytes():
    try:
        return int(pltpu.get_tpu_info().vmem_capacity_bytes)
    except Exception:
        return 64 * 1024 * 1024          # v7x-sized conservative fallback


def _tile_usage_bytes(tm, tk, tc):
    return (2 * tm * tk * 2              # X tile, bf16, double-buffered
            + 2 * tk * tc * 2            # W tile, bf16, double-buffered
            + 2 * tm * tc * 2            # out tile, bf16, double-buffered
            + tm * tc * 4                # f32 matmul accumulator scratch
            + 2 * 2 * tc * 4             # gamma / beta, double-buffered
            + 4 * tc * 4)                # sum / sumsq / scale / shift scratch


def _choose_tiles(m, kp, cp, budget):
    # Cout tile: a 256-wide block when it divides (256-wide v6e/v7x MXU), else 128.
    tc = 256 if cp % 256 == 0 else 128
    tc = min(tc, cp)
    # K-tile candidates: multiples of 128 that divide Kp, largest first.
    k_cands = sorted({t for t in (kp, 2048, 1024, 512, 256, 128)
                      if t <= kp and t % 128 == 0 and kp % t == 0}, reverse=True)
    # M tile: big rows (>=512 ~ 85% of HBM roofline), multiple of 16 (bf16 sublanes).
    tm = min(1024, _round_up(m, 16))
    while True:
        tk = next((t for t in k_cands if _tile_usage_bytes(tm, t, tc) <= budget),
                  k_cands[-1])
        if _tile_usage_bytes(tm, tk, tc) <= budget or tm <= 128:
            break
        tm = _round_up(tm // 2, 16)
    # Rebalance so M is not over-padded (e.g. M=1025 -> 2 x 528, not 2 x 1024).
    m_tiles = -(-m // tm)
    tm = _round_up(-(-m // m_tiles), 16)
    return tm, tk, tc


# ---------------------------------------------------------------------------
# Fused kernel: conv-as-matmul + train-mode BatchNorm + ReLU
#
# grid = (Cout blocks, pass, M tiles, K tiles)   (reduction axes innermost)
#   pass 0: accumulate X_tile @ W over K into acc scratch; at the last K step fold the
#           tile into per-channel sum / sumsq scratch.  The output block stays pinned
#           on M-block 0 (zero-initialized), so nothing bad can be written back.
#   pass 1: recompute acc (cheap for small K; see TODO for the large-K alternative),
#           normalize with the finished batch stats (scale/shift hoisted into scratch
#           once), ReLU, and store lane-dense bf16 tiles.
# ---------------------------------------------------------------------------
def _conv_bn_relu_kernel(x_ref, w_ref, g_ref, b_ref, o_ref,
                         acc_ref, sum_ref, sumsq_ref, scale_ref, shift_ref,
                         *, m_real, eps):
    p = pl.program_id(1)          # 0 = stats pass, 1 = normalize pass
    i = pl.program_id(2)          # M tile index
    k = pl.program_id(3)          # K tile index (innermost reduction)
    nk = pl.num_programs(3)

    @pl.when(jnp.logical_and(p == 0, jnp.logical_and(i == 0, k == 0)))
    def _init():
        sum_ref[...] = jnp.zeros_like(sum_ref)
        sumsq_ref[...] = jnp.zeros_like(sumsq_ref)
        # Pinned-but-unwritten pass-0 output block: make it zeros, never garbage.
        o_ref[...] = jnp.zeros_like(o_ref)

    @pl.when(k == 0)
    def _zero_acc():
        acc_ref[...] = jnp.zeros_like(acc_ref)

    # MXU: bf16 operands, f32 accumulate.  K and Cout are zero-padded to lane width.
    acc_ref[...] += jnp.dot(x_ref[...], w_ref[...], preferred_element_type=jnp.float32)

    @pl.when(jnp.logical_and(p == 0, k == nk - 1))
    def _stats():
        # Zero-padded M rows contribute exactly 0 to both sums (conv bias dropped), so
        # dividing by the *real* M below is exact.
        # TODO(synk): shifted/Welford update if |mean| >> std; and/or push these column
        # sums through the MXU (ones @ acc) if pass 0 turns out VALU-bound at small K.
        acc = acc_ref[...]
        sum_ref[...] += jnp.sum(acc, axis=0, keepdims=True)
        sumsq_ref[...] += jnp.sum(acc * acc, axis=0, keepdims=True)

    @pl.when(jnp.logical_and(p == 1, jnp.logical_and(i == 0, k == 0)))
    def _finalize_stats():
        inv_m = 1.0 / m_real
        mean = sum_ref[...] * inv_m
        var = jnp.maximum(sumsq_ref[...] * inv_m - mean * mean, 0.0)
        scale = g_ref[...] * jax.lax.rsqrt(var + eps)      # gamma / sqrt(var + eps)
        scale_ref[...] = scale
        shift_ref[...] = b_ref[...] - mean * scale         # beta - mean * scale

    @pl.when(jnp.logical_and(p == 1, k == nk - 1))
    def _normalize():
        o_ref[...] = jnp.maximum(
            acc_ref[...] * scale_ref[...] + shift_ref[...], 0.0).astype(o_ref.dtype)


def fused_conv_bn_relu(x_patches, w_mat, gamma, beta, *, m_real, eps,
                       tm, tk, tc, vmem_limit_bytes):
    mp, kp = x_patches.shape
    _, cp = w_mat.shape
    c_blocks, m_tiles, k_tiles = cp // tc, mp // tm, kp // tk
    # TODO(synk): when Kp > ~2*Cp (large-Cin 3x3 convs) write the unnormalized bf16 Y
    # to HBM in pass 0 and stream Y (not X) in pass 1 instead of recomputing the
    # matmul -- ~4.5x less pass-1 traffic; the recompute path below is the right trade
    # for small-K shapes like this one.
    return pl.pallas_call(
        functools.partial(_conv_bn_relu_kernel, m_real=float(m_real), eps=float(eps)),
        out_shape=jax.ShapeDtypeStruct((mp, cp), jnp.bfloat16),
        grid_spec=pltpu.PrefetchScalarGridSpec(
            num_scalar_prefetch=0,
            grid=(c_blocks, 2, m_tiles, k_tiles),
            in_specs=[
                pl.BlockSpec((tm, tk), lambda c, p, i, k: (i, k)),   # X tile
                # TODO(synk): pipeline_mode=pl.Buffered(1) for W/gamma/beta (constant
                # within a (c, p) slab) to reclaim the second buffer on VMEM-tight shapes.
                pl.BlockSpec((tk, tc), lambda c, p, i, k: (k, c)),   # W tile
                pl.BlockSpec((1, tc), lambda c, p, i, k: (0, c)),    # gamma
                pl.BlockSpec((1, tc), lambda c, p, i, k: (0, c)),    # beta
            ],
            # Pinned to M-block 0 during pass 0 (zero-initialized, never left garbage);
            # pass 1 writes every tile exactly once, lane-dense bf16.
            out_specs=pl.BlockSpec((tm, tc), lambda c, p, i, k: (i * p, c)),
            scratch_shapes=[
                pltpu.VMEM((tm, tc), jnp.float32),   # matmul accumulator
                pltpu.VMEM((1, tc), jnp.float32),    # per-channel sum
                pltpu.VMEM((1, tc), jnp.float32),    # per-channel sum of squares
                pltpu.VMEM((1, tc), jnp.float32),    # hoisted BN scale
                pltpu.VMEM((1, tc), jnp.float32),    # hoisted BN shift
            ],
        ),
        # Cout blocks are independent (per-channel stats) -> "parallel" feeds both v7x
        # TensorCores; pass/M/K carry cross-iteration scratch state -> "arbitrary".
        compiler_params=pltpu.CompilerParams(
            dimension_semantics=("parallel", "arbitrary", "arbitrary", "arbitrary"),
            vmem_limit_bytes=vmem_limit_bytes),
    )(x_patches, w_mat, gamma, beta)


# ---------------------------------------------------------------------------
# Layout plumbing (plain JAX)
# ---------------------------------------------------------------------------
def _im2col_nhwc(x_nhwc, kh, kw, stride, pad):
    N, H, W, C = x_nhwc.shape
    xp = jnp.pad(x_nhwc, ((0, 0), (pad, pad), (pad, pad), (0, 0)))
    Ho = (H + 2 * pad - kh) // stride + 1
    Wo = (W + 2 * pad - kw) // stride + 1
    taps = []
    for di in range(kh):
        for dj in range(kw):
            taps.append(xp[:, di:di + Ho * stride:stride, dj:dj + Wo * stride:stride, :])
    pat = jnp.stack(taps, axis=3)                        # (N, Ho, Wo, kh*kw, C)
    return pat.reshape(N * Ho * Wo, kh * kw * C), Ho, Wo


def conv_block_bn_forward(x_nchw, w_oihw, bias, gamma, beta, *,
                          stride, padding, eps=1e-5):
    # Per-channel conv bias is exactly cancelled by train-mode BatchNorm -> drop it.
    del bias
    N, Cin, H, W = x_nchw.shape
    Cout, _, kh, kw = w_oihw.shape

    # bf16 BEFORE im2col: the kh*kw-blown-up patch matrix hits HBM once, half-width.
    # TODO(synk): fold the kh*kw taps into the kernel (extra grid axis + offset
    # index_map into the padded NHWC input) to avoid materializing im2col at all.
    x_nhwc = jnp.transpose(x_nchw, (0, 2, 3, 1)).astype(jnp.bfloat16)
    x_patches, Ho, Wo = _im2col_nhwc(x_nhwc, kh, kw, stride, padding)

    M = N * Ho * Wo
    K = kh * kw * Cin
    Kp = _round_up(K, LANE)                 # lane-dense contraction
    Cp = _round_up(Cout, LANE)              # lane-dense output stores

    cap = _vmem_capacity_bytes()
    tm, tk, tc = _choose_tiles(M, Kp, Cp, budget=cap // 2)
    Mp = _round_up(M, tm)
    est = _tile_usage_bytes(tm, tk, tc)
    vmem_limit = int(min(cap * 3 // 4, max(4 * est + (8 << 20), 32 << 20)))

    x_pad = jnp.pad(x_patches, ((0, Mp - M), (0, Kp - K)))            # already bf16
    w_mat = jnp.transpose(w_oihw, (2, 3, 1, 0)).reshape(K, Cout)
    w_pad = jnp.pad(w_mat, ((0, Kp - K), (0, Cp - Cout))).astype(jnp.bfloat16)
    g_pad = jnp.pad(gamma.astype(jnp.float32), (0, Cp - Cout)).reshape(1, Cp)
    b_pad = jnp.pad(beta.astype(jnp.float32), (0, Cp - Cout)).reshape(1, Cp)

    z = fused_conv_bn_relu(x_pad, w_pad, g_pad, b_pad, m_real=M, eps=eps,
                           tm=tm, tk=tk, tc=tc, vmem_limit_bytes=vmem_limit)
    z = z[:M, :Cout].reshape(N, Ho, Wo, Cout)                         # bf16
    # TODO(synk): return NHWC (or fuse the layout change into the consumer); the NCHW
    # transpose is a full extra HBM round trip kept only for PyTorch-module parity.
    return jnp.transpose(z, (0, 3, 1, 2)).astype(jnp.float32)


if __name__ == "__main__":
    # ConvBlockBN(in_channels=4, out_channels=8, kernel_size=3, stride=1, padding=1)
    in_channels, out_channels, kernel_size, stride, padding = 4, 8, 3, 1, 1
    N, H, W = 2, 16, 16

    key = jax.random.PRNGKey(0)
    kx, kw_, kb = jax.random.split(key, 3)

    x = jax.random.normal(kx, (N, in_channels, H, W), dtype=jnp.float32)
    fan_in = in_channels * kernel_size * kernel_size
    w = jax.random.uniform(kw_, (out_channels, in_channels, kernel_size, kernel_size),
                           minval=-1.0, maxval=1.0, dtype=jnp.float32) / jnp.sqrt(fan_in)
    b = jax.random.uniform(kb, (out_channels,), minval=-0.1, maxval=0.1,
                           dtype=jnp.float32)
    gamma = jnp.ones((out_channels,), dtype=jnp.float32)    # BN weight init
    beta = jnp.zeros((out_channels,), dtype=jnp.float32)    # BN bias init

    fwd = jax.jit(functools.partial(conv_block_bn_forward,
                                    stride=stride, padding=padding))
    out = fwd(x, w, b, gamma, beta)
    jax.block_until_ready(out)
    assert out.shape == (N, out_channels, H, W)

    # Pure-JAX reference (f32 conv + bias + train-mode BN + ReLU).  bf16 MXU operands
    # and bf16 kernel output => loose tolerance.
    y = jax.lax.conv_general_dilated(
        x, w, window_strides=(stride, stride),
        padding=((padding, padding), (padding, padding)),
        dimension_numbers=("NCHW", "OIHW", "NCHW")) + b.reshape(1, -1, 1, 1)
    mu = jnp.mean(y, axis=(0, 2, 3), keepdims=True)
    var = jnp.mean((y - mu) ** 2, axis=(0, 2, 3), keepdims=True)
    ref = jnp.maximum((y - mu) * jax.lax.rsqrt(var + 1e-5)
                      * gamma.reshape(1, -1, 1, 1) + beta.reshape(1, -1, 1, 1), 0.0)
    assert float(jnp.max(jnp.abs(out - ref))) < 1e-1

    print("KERNEL_OK")
</pallas_src>

<mosaic_0001>
module attributes {stable_mosaic.version = 11 : i64} {
  func.func @_conv_bn_relu_kernel(%arg0: i32, %arg1: i32, %arg2: i32, %arg3: i32, %arg4: memref<512x128xbf16, #tpu.memory_space<vmem>>, %arg5: memref<128x128xbf16, #tpu.memory_space<vmem>>, %arg6: memref<1x128xf32, #tpu.memory_space<vmem>>, %arg7: memref<1x128xf32, #tpu.memory_space<vmem>>, %arg8: memref<512x128xbf16, #tpu.memory_space<vmem>>, %arg9: memref<512x128xf32, #tpu.memory_space<vmem>>, %arg10: memref<1x128xf32, #tpu.memory_space<vmem>>, %arg11: memref<1x128xf32, #tpu.memory_space<vmem>>, %arg12: memref<1x128xf32, #tpu.memory_space<vmem>>, %arg13: memref<1x128xf32, #tpu.memory_space<vmem>>) attributes {dimension_semantics = [#tpu.dimension_semantics<parallel>, #tpu.dimension_semantics<arbitrary>, #tpu.dimension_semantics<arbitrary>, #tpu.dimension_semantics<arbitrary>], iteration_bounds = array<i64: 1, 2, 1, 1>, scalar_prefetch = 0 : i64, scratch_operands = 5 : i64, tpu.core_type = #tpu.core_type<tc>, window_params = [{transform_indices = @transform_0, window_bounds = array<i64: 512, 128>}, {transform_indices = @transform_1, window_bounds = array<i64: 128, 128>}, {transform_indices = @transform_2, window_bounds = array<i64: 1, 128>}, {transform_indices = @transform_3, window_bounds = array<i64: 1, 128>}, {transform_indices = @transform_4, window_bounds = array<i64: 512, 128>}]} {
    %c0_i32 = arith.constant 0 : i32
    %0 = arith.cmpi eq, %arg1, %c0_i32 : i32
    %c0_i32_0 = arith.constant 0 : i32
    %1 = arith.cmpi eq, %arg2, %c0_i32_0 : i32
    %c0_i32_1 = arith.constant 0 : i32
    %2 = arith.cmpi eq, %arg3, %c0_i32_1 : i32
    %3 = arith.andi %1, %2 : i1
    %4 = arith.andi %0, %3 : i1
    %5 = arith.extui %4 : i1 to i32
    %c0_i32_2 = arith.constant 0 : i32
    %6 = arith.cmpi ne, %5, %c0_i32_2 : i32
    scf.if %6 {
      %cst_21 = arith.constant 0.000000e+00 : f32
      %33 = vector.broadcast %cst_21 : f32 to vector<1x128xf32>
      %c0_22 = arith.constant 0 : index
      %c0_23 = arith.constant 0 : index
      %34 = vector.load %arg10[%c0_22, %c0_23] : memref<1x128xf32, #tpu.memory_space<vmem>>, vector<1x128xf32>
      tpu.vector_store %arg10[%c0_22, %c0_23], %33 {strides = array<i32>} : memref<1x128xf32, #tpu.memory_space<vmem>>, vector<1x128xf32>,
      %cst_24 = arith.constant 0.000000e+00 : f32
      %35 = vector.broadcast %cst_24 : f32 to vector<1x128xf32>
      %c0_25 = arith.constant 0 : index
      %c0_26 = arith.constant 0 : index
      %36 = vector.load %arg11[%c0_25, %c0_26] : memref<1x128xf32, #tpu.memory_space<vmem>>, vector<1x128xf32>
      tpu.vector_store %arg11[%c0_25, %c0_26], %35 {strides = array<i32>} : memref<1x128xf32, #tpu.memory_space<vmem>>, vector<1x128xf32>,
      %cst_27 = arith.constant 0.000000e+00 : bf16
      %37 = vector.broadcast %cst_27 : bf16 to vector<512x128xbf16>
      %c0_28 = arith.constant 0 : index
      %c0_29 = arith.constant 0 : index
      %38 = vector.load %arg8[%c0_28, %c0_29] : memref<512x128xbf16, #tpu.memory_space<vmem>>, vector<512x128xbf16>
      tpu.vector_store %arg8[%c0_28, %c0_29], %37 {strides = array<i32>} : memref<512x128xbf16, #tpu.memory_space<vmem>>, vector<512x128xbf16>,
    } else {
    }
    %c0_i32_3 = arith.constant 0 : i32
    %7 = arith.cmpi eq, %arg3, %c0_i32_3 : i32
    %8 = arith.extui %7 : i1 to i32
    %c0_i32_4 = arith.constant 0 : i32
    %9 = arith.cmpi ne, %8, %c0_i32_4 : i32
    scf.if %9 {
      %cst_21 = arith.constant 0.000000e+00 : f32
      %33 = vector.broadcast %cst_21 : f32 to vector<512x128xf32>
      %c0_22 = arith.constant 0 : index
      %c0_23 = arith.constant 0 : index
      %34 = vector.load %arg9[%c0_22, %c0_23] : memref<512x128xf32, #tpu.memory_space<vmem>>, vector<512x128xf32>
      tpu.vector_store %arg9[%c0_22, %c0_23], %33 {strides = array<i32>} : memref<512x128xf32, #tpu.memory_space<vmem>>, vector<512x128xf32>,
    } else {
    }
    %c0 = arith.constant 0 : index
    %c0_5 = arith.constant 0 : index
    %10 = vector.load %arg9[%c0, %c0_5] : memref<512x128xf32, #tpu.memory_space<vmem>>, vector<512x128xf32>
    %c0_6 = arith.constant 0 : index
    %c0_7 = arith.constant 0 : index
    %11 = vector.load %arg4[%c0_6, %c0_7] : memref<512x128xbf16, #tpu.memory_space<vmem>>, vector<512x128xbf16>
    %c0_8 = arith.constant 0 : index
    %c0_9 = arith.constant 0 : index
    %12 = vector.load %arg5[%c0_8, %c0_9] : memref<128x128xbf16, #tpu.memory_space<vmem>>, vector<128x128xbf16>
    %cst = arith.constant dense<0.000000e+00> : vector<512x128xf32>
    %13 = tpu.matmul %11, %12, %cst {dimension_numbers = #tpu.dot_dimension_numbers<[1], [0], [0], [1], [0, 0, 1, 1], [], []>} : vector<512x128xbf16>, vector<128x128xbf16>, vector<512x128xf32> -> vector<512x128xf32>
    %14 = arith.addf %10, %13 : vector<512x128xf32>
    %c0_10 = arith.constant 0 : index
    %c0_11 = arith.constant 0 : index
    %15 = vector.load %arg9[%c0_10, %c0_11] : memref<512x128xf32, #tpu.memory_space<vmem>>, vector<512x128xf32>
    tpu.vector_store %arg9[%c0_10, %c0_11], %14 {strides = array<i32>} : memref<512x128xf32, #tpu.memory_space<vmem>>, vector<512x128xf32>,
    %c0_i32_12 = arith.constant 0 : i32
    %16 = arith.cmpi eq, %arg1, %c0_i32_12 : i32
    %c0_i32_13 = arith.constant 0 : i32
    %17 = arith.cmpi eq, %arg3, %c0_i32_13 : i32
    %18 = arith.andi %16, %17 : i1
    %19 = arith.extui %18 : i1 to i32
    %c0_i32_14 = arith.constant 0 : i32
    %20 = arith.cmpi ne, %19, %c0_i32_14 : i32
    scf.if %20 {
      %c0_21 = arith.constant 0 : index
      %c0_22 = arith.constant 0 : index
      %33 = vector.load %arg9[%c0_21, %c0_22] : memref<512x128xf32, #tpu.memory_space<vmem>>, vector<512x128xf32>
      %c0_23 = arith.constant 0 : index
      %c0_24 = arith.constant 0 : index
      %34 = vector.load %arg10[%c0_23, %c0_24] : memref<1x128xf32, #tpu.memory_space<vmem>>, vector<1x128xf32>
      %cst_25 = arith.constant dense<0.000000e+00> : vector<128xf32>
      %35 = vector.multi_reduction <add>, %33, %cst_25 [0] : vector<512x128xf32> to vector<128xf32>
      %36 = vector.shape_cast %35 : vector<128xf32> to vector<1x128xf32>
      %37 = arith.addf %34, %36 : vector<1x128xf32>
      %c0_26 = arith.constant 0 : index
      %c0_27 = arith.constant 0 : index
      %38 = vector.load %arg10[%c0_26, %c0_27] : memref<1x128xf32, #tpu.memory_space<vmem>>, vector<1x128xf32>
      tpu.vector_store %arg10[%c0_26, %c0_27], %37 {strides = array<i32>} : memref<1x128xf32, #tpu.memory_space<vmem>>, vector<1x128xf32>,
      %c0_28 = arith.constant 0 : index
      %c0_29 = arith.constant 0 : index
      %39 = vector.load %arg11[%c0_28, %c0_29] : memref<1x128xf32, #tpu.memory_space<vmem>>, vector<1x128xf32>
      %40 = arith.mulf %33, %33 : vector<512x128xf32>
      %cst_30 = arith.constant dense<0.000000e+00> : vector<128xf32>
      %41 = vector.multi_reduction <add>, %40, %cst_30 [0] : vector<512x128xf32> to vector<128xf32>
      %42 = vector.shape_cast %41 : vector<128xf32> to vector<1x128xf32>
      %43 = arith.addf %39, %42 : vector<1x128xf32>
      %c0_31 = arith.constant 0 : index
      %c0_32 = arith.constant 0 : index
      %44 = vector.load %arg11[%c0_31, %c0_32] : memref<1x128xf32, #tpu.memory_space<vmem>>, vector<1x128xf32>
      tpu.vector_store %arg11[%c0_31, %c0_32], %43 {strides = array<i32>} : memref<1x128xf32, #tpu.memory_space<vmem>>, vector<1x128xf32>,
    } else {
    }
    %c1_i32 = arith.constant 1 : i32
    %21 = arith.cmpi eq, %arg1, %c1_i32 : i32
    %c0_i32_15 = arith.constant 0 : i32
    %22 = arith.cmpi eq, %arg2, %c0_i32_15 : i32
    %c0_i32_16 = arith.constant 0 : i32
    %23 = arith.cmpi eq, %arg3, %c0_i32_16 : i32
    %24 = arith.andi %22, %23 : i1
    %25 = arith.andi %21, %24 : i1
    %26 = arith.extui %25 : i1 to i32
    %c0_i32_17 = arith.constant 0 : i32
    %27 = arith.cmpi ne, %26, %c0_i32_17 : i32
    scf.if %27 {
      %c0_21 = arith.constant 0 : index
      %c0_22 = arith.constant 0 : index
      %33 = vector.load %arg10[%c0_21, %c0_22] : memref<1x128xf32, #tpu.memory_space<vmem>>, vector<1x128xf32>
      %cst_23 = arith.constant 0.001953125 : f32
      %34 = vector.broadcast %cst_23 : f32 to vector<1x128xf32>
      %35 = arith.mulf %33, %34 : vector<1x128xf32>
      %c0_24 = arith.constant 0 : index
      %c0_25 = arith.constant 0 : index
      %36 = vector.load %arg11[%c0_24, %c0_25] : memref<1x128xf32, #tpu.memory_space<vmem>>, vector<1x128xf32>
      %cst_26 = arith.constant 0.001953125 : f32
      %37 = vector.broadcast %cst_26 : f32 to vector<1x128xf32>
      %38 = arith.mulf %36, %37 : vector<1x128xf32>
      %39 = arith.mulf %35, %35 : vector<1x128xf32>
      %40 = arith.subf %38, %39 : vector<1x128xf32>
      %cst_27 = arith.constant 0.000000e+00 : f32
      %41 = vector.broadcast %cst_27 : f32 to vector<1x128xf32>
      %42 = arith.maximumf %40, %41 : vector<1x128xf32>
      %c0_28 = arith.constant 0 : index
      %c0_29 = arith.constant 0 : index
      %43 = vector.load %arg6[%c0_28, %c0_29] : memref<1x128xf32, #tpu.memory_space<vmem>>, vector<1x128xf32>
      %cst_30 = arith.constant 9.99999974E-6 : f32
      %44 = vector.broadcast %cst_30 : f32 to vector<1x128xf32>
      %45 = arith.addf %42, %44 : vector<1x128xf32>
      %46 = math.rsqrt %45 : vector<1x128xf32>
      %47 = arith.mulf %43, %46 : vector<1x128xf32>
      %c0_31 = arith.constant 0 : index
      %c0_32 = arith.constant 0 : index
      %48 = vector.load %arg12[%c0_31, %c0_32] : memref<1x128xf32, #tpu.memory_space<vmem>>, vector<1x128xf32>
      tpu.vector_store %arg12[%c0_31, %c0_32], %47 {strides = array<i32>} : memref<1x128xf32, #tpu.memory_space<vmem>>, vector<1x128xf32>,
      %c0_33 = arith.constant 0 : index
      %c0_34 = arith.constant 0 : index
      %49 = vector.load %arg7[%c0_33, %c0_34] : memref<1x128xf32, #tpu.memory_space<vmem>>, vector<1x128xf32>
      %50 = arith.mulf %35, %47 : vector<1x128xf32>
      %51 = arith.subf %49, %50 : vector<1x128xf32>
      %c0_35 = arith.constant 0 : index
      %c0_36 = arith.constant 0 : index
      %52 = vector.load %arg13[%c0_35, %c0_36] : memref<1x128xf32, #tpu.memory_space<vmem>>, vector<1x128xf32>
      tpu.vector_store %arg13[%c0_35, %c0_36], %51 {strides = array<i32>} : memref<1x128xf32, #tpu.memory_space<vmem>>, vector<1x128xf32>,
    } else {
    }
    %c1_i32_18 = arith.constant 1 : i32
    %28 = arith.cmpi eq, %arg1, %c1_i32_18 : i32
    %c0_i32_19 = arith.constant 0 : i32
    %29 = arith.cmpi eq, %arg3, %c0_i32_19 : i32
    %30 = arith.andi %28, %29 : i1
    %31 = arith.extui %30 : i1 to i32
    %c0_i32_20 = arith.constant 0 : i32
    %32 = arith.cmpi ne, %31, %c0_i32_20 : i32
    scf.if %32 {
      %c0_21 = arith.constant 0 : index
      %c0_22 = arith.constant 0 : index
      %33 = vector.load %arg9[%c0_21, %c0_22] : memref<512x128xf32, #tpu.memory_space<vmem>>, vector<512x128xf32>
      %c0_23 = arith.constant 0 : index
      %c0_24 = arith.constant 0 : index
      %34 = vector.load %arg12[%c0_23, %c0_24] : memref<1x128xf32, #tpu.memory_space<vmem>>, vector<1x128xf32>
      %35 = vector.broadcast %34 : vector<1x128xf32> to vector<512x128xf32>
      %36 = arith.mulf %33, %35 : vector<512x128xf32>
      %c0_25 = arith.constant 0 : index
      %c0_26 = arith.constant 0 : index
      %37 = vector.load %arg13[%c0_25, %c0_26] : memref<1x128xf32, #tpu.memory_space<vmem>>, vector<1x128xf32>
      %38 = vector.broadcast %37 : vector<1x128xf32> to vector<512x128xf32>
      %39 = arith.addf %36, %38 : vector<512x128xf32>
      %cst_27 = arith.constant 0.000000e+00 : f32
      %40 = vector.broadcast %cst_27 : f32 to vector<512x128xf32>
      %41 = arith.maximumf %39, %40 : vector<512x128xf32>
      %42 = arith.truncf %41 : vector<512x128xf32> to vector<512x128xbf16>
      %c0_28 = arith.constant 0 : index
      %c0_29 = arith.constant 0 : index
      %43 = vector.load %arg8[%c0_28, %c0_29] : memref<512x128xbf16, #tpu.memory_space<vmem>>, vector<512x128xbf16>
      tpu.vector_store %arg8[%c0_28, %c0_29], %42 {strides = array<i32>} : memref<512x128xbf16, #tpu.memory_space<vmem>>, vector<512x128xbf16>,
    } else {
    }
    return
  }
  func.func @transform_0(%arg0: i32, %arg1: i32, %arg2: i32, %arg3: i32) -> (i32, i32) {
    %c0_i32 = arith.constant 0 : i32
    return %arg2, %arg3 : i32, i32
  }
  func.func @transform_1(%arg0: i32, %arg1: i32, %arg2: i32, %arg3: i32) -> (i32, i32) {
    %c0_i32 = arith.constant 0 : i32
    return %arg3, %arg0 : i32, i32
  }
  func.func @transform_2(%arg0: i32, %arg1: i32, %arg2: i32, %arg3: i32) -> (i32, i32) {
    %c0_i32 = arith.constant 0 : i32
    %c0_i32_0 = arith.constant 0 : i32
    return %c0_i32, %arg0 : i32, i32
  }
  func.func @transform_3(%arg0: i32, %arg1: i32, %arg2: i32, %arg3: i32) -> (i32, i32) {
    %c0_i32 = arith.constant 0 : i32
    %c0_i32_0 = arith.constant 0 : i32
    return %c0_i32, %arg0 : i32, i32
  }
  func.func @transform_4(%arg0: i32, %arg1: i32, %arg2: i32, %arg3: i32) -> (i32, i32) {
    %0 = arith.muli %arg2, %arg1 : i32
    %c0_i32 = arith.constant 0 : i32
    return %0, %arg0 : i32, i32
  }
}

</mosaic_0001>

<bundles_post_ra>
// kernel: conv_block_bn_forward.1
= control target key start
LH: loop header
LB: loop body
LE: loop exit
PB: predicated region body
PF: predicated region fallthrough
CT: control target
= control target key end

     0   :  { %s2916_s15 = smov 0   ;;  %s2918_s16 = smov 0   ;;  %s3565_s0 = inlined_call_operand.vmem [shape: bf16[512,128], index: 0, kind: input, shape index: {}]   ;;  %s3566_s1 = inlined_call_operand.vmem [shape: bf16[128,128], index: 1, kind: input, shape index: {}]   ;;  %s3567_s2 = inlined_call_operand.vmem [shape: f32[1,128], index: 2, kind: input, shape index: {}]   ;;  %s3568_s3 = inlined_call_operand.vmem [shape: f32[1,128], index: 3, kind: input, shape index: {}]   ;;  %s3569_s4 = inlined_call_operand.vmem [shape: bf16[512,128], index: 4, kind: output, shape index: {}]  }
   0x1   :  { %s2920_s17 = smov 0  }
   0x2 LB: > { %s36_s18 = sadd.s32 1, %s2883_s16  ;;  %p2286_p0 = scmp.ge.s32.totalorder %s2887_s17, 1  ;;  %s2887_s17 = sphi %s2920_s17, %s14_s17   ;;  %s2883_s16 = sphi %s2918_s16, %s3571_s16   ;;  %s2879_s15 = sphi %s2916_s15, %s3570_s15  }
   0x3   : > { %p38_p1 = scmp.ge.s32.totalorder %s36_s18, 2  ;;  %p230_p2 = scmp.lt.s32.totalorder %s2887_s17, 3 }
   0x5   : > { %s3573_s18 = smov (%p38_p1, %s36_s18), 0  ;;  %p231_p3 = pnand %p2286_p0, %p230_p2 }
   0x6   : > { %p313_p4 = scmp.eq.s32.totalorder (!%p231_p3), %s2879_s15, 0 }
   0x7   : > { %234 = sbr.rel (%p231_p3) target bundleno = 564 (0x234), region = 36 }
   0xe   : > { %321 = sbr.rel (!%p313_p4) target bundleno = 48 (0x30), region = 40  ;;  %v2889_v0 = vmov (%p313_p4), 0.0   ;;  %v2890_v1 = vmov (%p313_p4), 0  }
   0xf   : > { %322 = vst [vmem:[#allocation3] sm:$0x1] (%p313_p4), %v2889_v0  ;;  %323 = vst [vmem:[#allocation4] sm:$0x1] (%p313_p4), %v2889_v0 }
  0x10   : > { %324 = vst [vmem:[%s3569_s4] sm:$0xf] (%p313_p4), %v2890_v1  ;;  %325 = vst [vmem:[%s3569_s4 + $0x4] sm:$0xf] (%p313_p4), %v2890_v1 }
  0x11   : > { %326 = vst [vmem:[%s3569_s4 + $0x8] sm:$0xf] (%p313_p4), %v2890_v1  ;;  %327 = vst [vmem:[%s3569_s4 + $0xc] sm:$0xf] (%p313_p4), %v2890_v1 }
  0x12   : > { %328 = vst [vmem:[%s3569_s4 + $0x10] sm:$0xf] (%p313_p4), %v2890_v1  ;;  %329 = vst [vmem:[%s3569_s4 + $0x14] sm:$0xf] (%p313_p4), %v2890_v1 }
  0x13   : > { %330 = vst [vmem:[%s3569_s4 + $0x18] sm:$0xf] (%p313_p4), %v2890_v1  ;;  %331 = vst [vmem:[%s3569_s4 + $0x1c] sm:$0xf] (%p313_p4), %v2890_v1 }
  0x14   : > { %332 = vst [vmem:[%s3569_s4 + $0x20] sm:$0xf] (%p313_p4), %v2890_v1  ;;  %333 = vst [vmem:[%s3569_s4 + $0x24] sm:$0xf] (%p313_p4), %v2890_v1 }
  0x15   : > { %334 = vst [vmem:[%s3569_s4 + $0x28] sm:$0xf] %v2890_v1  ;;  %335 = vst [vmem:[%s3569_s4 + $0x2c] sm:$0xf] %v2890_v1 }
  0x16   : > { %336 = vst [vmem:[%s3569_s4 + $0x30] sm:$0xf] %v2890_v1  ;;  %337 = vst [vmem:[%s3569_s4 + $0x34] sm:$0xf] %v2890_v1 }
  0x17   : > { %338 = vst [vmem:[%s3569_s4 + $0x38] sm:$0xf] %v2890_v1  ;;  %339 = vst [vmem:[%s3569_s4 + $0x3c] sm:$0xf] %v2890_v1 }
  0x18   : > { %340 = vst [vmem:[%s3569_s4 + $0x40] sm:$0xf] %v2890_v1  ;;  %341 = vst [vmem:[%s3569_s4 + $0x44] sm:$0xf] %v2890_v1 }
  0x19   : > { %342 = vst [vmem:[%s3569_s4 + $0x48] sm:$0xf] %v2890_v1  ;;  %343 = vst [vmem:[%s3569_s4 + $0x4c] sm:$0xf] %v2890_v1 }
  0x1a   : > { %344 = vst [vmem:[%s3569_s4 + $0x50] sm:$0xf] %v2890_v1  ;;  %345 = vst [vmem:[%s3569_s4 + $0x54] sm:$0xf] %v2890_v1 }
  0x1b   : > { %346 = vst [vmem:[%s3569_s4 + $0x58] sm:$0xf] %v2890_v1  ;;  %347 = vst [vmem:[%s3569_s4 + $0x5c] sm:$0xf] %v2890_v1 }
  0x1c   : > { %348 = vst [vmem:[%s3569_s4 + $0x60] sm:$0xf] %v2890_v1  ;;  %349 = vst [vmem:[%s3569_s4 + $0x64] sm:$0xf] %v2890_v1 }
  0x1d   : > { %350 = vst [vmem:[%s3569_s4 + $0x68] sm:$0xf] %v2890_v1  ;;  %351 = vst [vmem:[%s3569_s4 + $0x6c] sm:$0xf] %v2890_v1 }
  0x1e   : > { %352 = vst [vmem:[%s3569_s4 + $0x70] sm:$0xf] %v2890_v1  ;;  %353 = vst [vmem:[%s3569_s4 + $0x74] sm:$0xf] %v2890_v1 }
  0x1f   : > { %354 = vst [vmem:[%s3569_s4 + $0x78] sm:$0xf] %v2890_v1  ;;  %355 = vst [vmem:[%s3569_s4 + $0x7c] sm:$0xf] %v2890_v1 }
  0x20   : > { %356 = vst [vmem:[%s3569_s4 + $0x80] sm:$0xf] %v2890_v1  ;;  %357 = vst [vmem:[%s3569_s4 + $0x84] sm:$0xf] %v2890_v1 }
  0x21   : > { %358 = vst [vmem:[%s3569_s4 + $0x88] sm:$0xf] %v2890_v1  ;;  %359 = vst [vmem:[%s3569_s4 + $0x8c] sm:$0xf] %v2890_v1 }
  0x22   : > { %360 = vst [vmem:[%s3569_s4 + $0x90] sm:$0xf] %v2890_v1  ;;  %361 = vst [vmem:[%s3569_s4 + $0x94] sm:$0xf] %v2890_v1 }
  0x23   : > { %362 = vst [vmem:[%s3569_s4 + $0x98] sm:$0xf] %v2890_v1  ;;  %363 = vst [vmem:[%s3569_s4 + $0x9c] sm:$0xf] %v2890_v1 }
  0x24   : > { %364 = vst [vmem:[%s3569_s4 + $0xa0] sm:$0xf] %v2890_v1  ;;  %365 = vst [vmem:[%s3569_s4 + $0xa4] sm:$0xf] %v2890_v1 }
  0x25   : > { %366 = vst [vmem:[%s3569_s4 + $0xa8] sm:$0xf] %v2890_v1  ;;  %367 = vst [vmem:[%s3569_s4 + $0xac] sm:$0xf] %v2890_v1 }
  0x26   : > { %368 = vst [vmem:[%s3569_s4 + $0xb0] sm:$0xf] %v2890_v1  ;;  %369 = vst [vmem:[%s3569_s4 + $0xb4] sm:$0xf] %v2890_v1 }
  0x27   : > { %370 = vst [vmem:[%s3569_s4 + $0xb8] sm:$0xf] %v2890_v1  ;;  %371 = vst [vmem:[%s3569_s4 + $0xbc] sm:$0xf] %v2890_v1 }
  0x28   : > { %372 = vst [vmem:[%s3569_s4 + $0xc0] sm:$0xf] %v2890_v1  ;;  %373 = vst [vmem:[%s3569_s4 + $0xc4] sm:$0xf] %v2890_v1 }
  0x29   : > { %374 = vst [vmem:[%s3569_s4 + $0xc8] sm:$0xf] %v2890_v1  ;;  %375 = vst [vmem:[%s3569_s4 + $0xcc] sm:$0xf] %v2890_v1 }
  0x2a   : > { %376 = vst [vmem:[%s3569_s4 + $0xd0] sm:$0xf] %v2890_v1  ;;  %377 = vst [vmem:[%s3569_s4 + $0xd4] sm:$0xf] %v2890_v1 }
  0x2b   : > { %378 = vst [vmem:[%s3569_s4 + $0xd8] sm:$0xf] %v2890_v1  ;;  %379 = vst [vmem:[%s3569_s4 + $0xdc] sm:$0xf] %v2890_v1 }
  0x2c   : > { %380 = vst [vmem:[%s3569_s4 + $0xe0] sm:$0xf] %v2890_v1  ;;  %381 = vst [vmem:[%s3569_s4 + $0xe4] sm:$0xf] %v2890_v1 }
  0x2d   : > { %382 = vst [vmem:[%s3569_s4 + $0xe8] sm:$0xf] %v2890_v1  ;;  %383 = vst [vmem:[%s3569_s4 + $0xec] sm:$0xf] %v2890_v1 }
  0x2e   : > { %384 = vst [vmem:[%s3569_s4 + $0xf0] sm:$0xf] %v2890_v1  ;;  %385 = vst [vmem:[%s3569_s4 + $0xf4] sm:$0xf] %v2890_v1 }
  0x2f   : > { %386 = vst [vmem:[%s3569_s4 + $0xf8] sm:$0xf] %v2890_v1  ;;  %387 = vst [vmem:[%s3569_s4 + $0xfc] sm:$0xf] %v2890_v1 }
  0x30 PF: > { %v2823_v2 = vld [vmem:[%s3566_s1] sm:$0xff]   ;;  %v2824_v3 = vld [vmem:[%s3566_s1 + $0x8] sm:$0xff]   ;;  %v2825_v4 = vld [vmem:[%s3566_s1 + $0x10] sm:$0xff]  }
  0x31   : > { %2700 = vmatprep.subr.bf16.mxu0 %v2823_v2  ;;  %2780 = vmatprep.subr.bf16.mxu1 %v2823_v2  ;;  %v2826_v5 = vld [vmem:[%s3566_s1 + $0x18] sm:$0xff]   ;;  %v2831_v6 = vld [vmem:[%s3565_s0] sm:$0xff]   ;;  %v2828_v9 = vld [vmem:[%s3566_s1 + $0x28] sm:$0xff]  }
  0x32   : > { %2701 = vmatpush3.bf16.msra.mxu0 %v2823_v2  ;;  %2788 = vmatpush3.bf16.msra.mxu1 %v2823_v2  ;;  %v2832_v7 = vld [vmem:[%s3565_s0 + $0x80] sm:$0xff]   ;;  %v2829_v10 = vld [vmem:[%s3566_s1 + $0x30] sm:$0xff]   ;;  %v2830_v11 = vld [vmem:[%s3566_s1 + $0x38] sm:$0xff]  }
  0x33   : > { %2702 = vmatprep.subr.bf16.mxu0 %v2824_v3  ;;  %2781 = vmatprep.subr.bf16.mxu1 %v2824_v3  ;;  %v2827_v8 = vld [vmem:[%s3566_s1 + $0x20] sm:$0xff]   ;;  %v2833_v12 = vld [vmem:[%s3565_s0 + $0x8] sm:$0xff]   ;;  %v2835_v14 = vld [vmem:[%s3565_s0 + $0x10] sm:$0xff]  }
  0x34   : > { %2716 = vmatprep.mubr.bf16.mxu0 %v2831_v6  ;;  %2748 = vmatprep.mubr.bf16.mxu1 %v2832_v7  ;;  %v2834_v13 = vld [vmem:[%s3565_s0 + $0x88] sm:$0xff]   ;;  %v2836_v15 = vld [vmem:[%s3565_s0 + $0x90] sm:$0xff]   ;;  %v2837_v16 = vld [vmem:[%s3565_s0 + $0x18] sm:$0xff]  }
  0x35   : > { %v2838_v17 = vld [vmem:[%s3565_s0 + $0x98] sm:$0xff]   ;;  %v2839_v18 = vld [vmem:[%s3565_s0 + $0x20] sm:$0xff]   ;;  %v2841_v20 = vld [vmem:[%s3565_s0 + $0x28] sm:$0xff]  }
  0x36   : > { %2703 = vmatpush3.bf16.msra.mxu0 %v2824_v3  ;;  %2789 = vmatpush3.bf16.msra.mxu1 %v2824_v3  ;;  %v2840_v19 = vld [vmem:[%s3565_s0 + $0xa0] sm:$0xff]   ;;  %v2842_v21 = vld [vmem:[%s3565_s0 + $0xa8] sm:$0xff]   ;;  %v2843_v22 = vld [vmem:[%s3565_s0 + $0x30] sm:$0xff]  }
  0x37   : > { %2704 = vmatprep.subr.bf16.mxu0 %v2825_v4  ;;  %2782 = vmatprep.subr.bf16.mxu1 %v2825_v4  ;;  %v2844_v23 = vld [vmem:[%s3565_s0 + $0xb0] sm:$0xff]   ;;  %v2845_v24 = vld [vmem:[%s3565_s0 + $0x38] sm:$0xff]   ;;  %v2847_v26 = vld [vmem:[%s3565_s0 + $0x40] sm:$0xff]  }
  0x38   : > { %v2846_v25 = vld [vmem:[%s3565_s0 + $0xb8] sm:$0xff]   ;;  %v2848_v27 = vld [vmem:[%s3565_s0 + $0xc0] sm:$0xff]   ;;  %v2849_v28 = vld [vmem:[%s3565_s0 + $0x48] sm:$0xff]  }
  0x39   : > { %v2850_v29 = vld [vmem:[%s3565_s0 + $0xc8] sm:$0xff]   ;;  %v2851_v30 = vld [vmem:[%s3565_s0 + $0x50] sm:$0xff]   ;;  %v2853_v32 = vld [vmem:[%s3565_s0 + $0x58] sm:$0xff]  }
  0x3a   : > { %2705 = vmatpush3.bf16.msra.mxu0 %v2825_v4  ;;  %2790 = vmatpush3.bf16.msra.mxu1 %v2825_v4  ;;  %v2852_v31 = vld [vmem:[%s3565_s0 + $0xd0] sm:$0xff]   ;;  %v2854_v33 = vld [vmem:[%s3565_s0 + $0xd8] sm:$0xff]   ;;  %v2855_v34 = vld [vmem:[%s3565_s0 + $0x60] sm:$0xff]  }
  0x3b   : > { %2706 = vmatprep.subr.bf16.mxu0 %v2826_v5  ;;  %2783 = vmatprep.subr.bf16.mxu1 %v2826_v5  ;;  %v2856_v35 = vld [vmem:[%s3565_s0 + $0xe0] sm:$0xff]   ;;  %v2857_v36 = vld [vmem:[%s3565_s0 + $0x68] sm:$0xff]   ;;  %v2859_v38 = vld [vmem:[%s3565_s0 + $0x70] sm:$0xff]  }
  0x3c   : > { %v2858_v37 = vld [vmem:[%s3565_s0 + $0xe8] sm:$0xff]   ;;  %v2860_v39 = vld [vmem:[%s3565_s0 + $0xf0] sm:$0xff]   ;;  %v2861_v40 = vld [vmem:[%s3565_s0 + $0x78] sm:$0xff]  }
  0x3d   : > { %v2862_v41 = vld [vmem:[%s3565_s0 + $0xf8] sm:$0xff]  }
  0x3e   : > { %2707 = vmatpush3.bf16.msra.mxu0 %v2826_v5  ;;  %2791 = vmatpush3.bf16.msra.mxu1 %v2826_v5 }
  0x3f   : > { %2708 = vmatprep.subr.bf16.mxu0 %v2827_v8  ;;  %2784 = vmatprep.subr.bf16.mxu1 %v2827_v8 }
  0x42   : > { %2709 = vmatpush3.bf16.msra.mxu0 %v2827_v8  ;;  %2792 = vmatpush3.bf16.msra.mxu1 %v2827_v8 }
  0x43   : > { %2710 = vmatprep.subr.bf16.mxu0 %v2828_v9  ;;  %2785 = vmatprep.subr.bf16.mxu1 %v2828_v9 }
  0x46   : > { %2711 = vmatpush3.bf16.msra.mxu0 %v2828_v9  ;;  %2793 = vmatpush3.bf16.msra.mxu1 %v2828_v9 }
  0x47   : > { %2712 = vmatprep.subr.bf16.mxu0 %v2829_v10  ;;  %2786 = vmatprep.subr.bf16.mxu1 %v2829_v10 }
  0x4a   : > { %2713 = vmatpush3.bf16.msra.mxu0 %v2829_v10  ;;  %2794 = vmatpush3.bf16.msra.mxu1 %v2829_v10 }
  0x4b   : > { %2714 = vmatprep.subr.bf16.mxu0 %v2830_v11  ;;  %2787 = vmatprep.subr.bf16.mxu1 %v2830_v11 }
  0x4e   : > { %2715 = vmatpush3.bf16.msra.mxu0 %v2830_v11  ;;  %2795 = vmatpush3.bf16.msra.mxu1 %v2830_v11 }
  0x51   : > { %2717 = vmatmul.mubr.bf16.vlgmr.msra.gmra.mrb[0].mxu0 %v2833_v12  ;;  %2749 = vmatmul.mubr.bf16.vlgmr.msra.gmra.mrb[0].mxu1 %v2834_v13 }
  0x52   : > { %2720 = vmatprep.mubr.bf16.mxu0 %v2835_v14  ;;  %2752 = vmatprep.mubr.bf16.mxu1 %v2836_v15 }
  0x59   : > { %2721 = vmatmul.mubr.bf16.gmra.mrb[4].mxu0 %v2837_v16  ;;  %2753 = vmatmul.mubr.bf16.gmra.mrb[4].mxu1 %v2838_v17 }
  0x5a   : > { %2724 = vmatprep.mubr.bf16.mxu0 %v2839_v18  ;;  %2756 = vmatprep.mubr.bf16.mxu1 %v2840_v19 }
  0x61   : > { %2725 = vmatmul.mubr.bf16.gmra.mrb[8].mxu0 %v2841_v20  ;;  %2757 = vmatmul.mubr.bf16.gmra.mrb[8].mxu1 %v2842_v21 }
  0x62   : > { %2728 = vmatprep.mubr.bf16.mxu0 %v2843_v22  ;;  %2760 = vmatprep.mubr.bf16.mxu1 %v2844_v23 }
  0x69   : > { %2729 = vmatmul.mubr.bf16.gmra.mrb[12].mxu0 %v2845_v24  ;;  %2761 = vmatmul.mubr.bf16.gmra.mrb[12].mxu1 %v2846_v25 }
  0x6a   : > { %2732 = vmatprep.mubr.bf16.mxu0 %v2847_v26  ;;  %2764 = vmatprep.mubr.bf16.mxu1 %v2848_v27 }
  0x71   : > { %2733 = vmatmul.mubr.bf16.gmra.mrb[16].mxu0 %v2849_v28  ;;  %2765 = vmatmul.mubr.bf16.gmra.mrb[16].mxu1 %v2850_v29 }
  0x72   : > { %2736 = vmatprep.mubr.bf16.mxu0 %v2851_v30  ;;  %2768 = vmatprep.mubr.bf16.mxu1 %v2852_v31 }
  0x79   : > { %2737 = vmatmul.mubr.bf16.gmra.mrb[20].mxu0 %v2853_v32  ;;  %2769 = vmatmul.mubr.bf16.gmra.mrb[20].mxu1 %v2854_v33 }
  0x7a   : > { %2740 = vmatprep.mubr.bf16.mxu0 %v2855_v34  ;;  %2772 = vmatprep.mubr.bf16.mxu1 %v2856_v35 }
  0x81   : > { %2741 = vmatmul.mubr.bf16.gmra.mrb[24].mxu0 %v2857_v36  ;;  %2773 = vmatmul.mubr.bf16.gmra.mrb[24].mxu1 %v2858_v37 }
  0x82   : > { %2744 = vmatprep.mubr.bf16.mxu0 %v2859_v38  ;;  %2776 = vmatprep.mubr.bf16.mxu1 %v2860_v39 }
  0x89   : > { %2745 = vmatmul.mubr.bf16.gmra.mrb[28].mxu0 %v2861_v40  ;;  %2777 = vmatmul.mubr.bf16.gmra.mrb[28].mxu1 %v2862_v41 }
 0x124   : > { %v2718_v42 = vpop.f32.mrb[0].mxu0  ;;  %v2750_v43 = vpop.f32.mrb[0].mxu1 }
 0x125   : > { %v873_v44 = vpop.f32.mrb[1].mxu0  ;;  %v1001_v45 = vpop.f32.mrb[1].mxu1  ;;  %1194 = vst [vmem:[#allocation2 + $0x10] sm:$0xff] %v2718_v42  ;;  %1226 = vst [vmem:[#allocation2 + $0x110] sm:$0xff] %v2750_v43 }
 0x126   : > { %v2719_v46 = vpop.f32.mrb[2].mxu0  ;;  %v2751_v47 = vpop.f32.mrb[2].mxu1  ;;  %1192 = vst [vmem:[#allocation2] sm:$0xff] %v873_v44  ;;  %1224 = vst [vmem:[#allocation2 + $0x100] sm:$0xff] %v1001_v45 }
 0x127   : > { %v876_v48 = vpop.f32.mrb[3].mxu0  ;;  %v1004_v49 = vpop.f32.mrb[3].mxu1  ;;  %1195 = vst [vmem:[#allocation2 + $0x18] sm:$0xff] %v2719_v46  ;;  %1227 = vst [vmem:[#allocation2 + $0x118] sm:$0xff] %v2751_v47 }
 0x128   : > { %1193 = vst [vmem:[#allocation2 + $0x8] sm:$0xff] %v876_v48  ;;  %1225 = vst [vmem:[#allocation2 + $0x108] sm:$0xff] %v1004_v49 }
 0x12c   : > { %v2722_v50 = vpop.f32.mrb[4].mxu0  ;;  %v2754_v51 = vpop.f32.mrb[4].mxu1  ;;  %v1262_v44 = vld [vmem:[#allocation2 + $0x10] sm:$0xff] (%p313_p4) }
 0x12d   : > { %v889_v52 = vpop.f32.mrb[5].mxu0  ;;  %v1017_v53 = vpop.f32.mrb[5].mxu1  ;;  %1198 = vst [vmem:[#allocation2 + $0x30] sm:$0xff] %v2722_v50  ;;  %1230 = vst [vmem:[#allocation2 + $0x130] sm:$0xff] %v2754_v51  ;;  %v1260_v42 = vld [vmem:[#allocation2] sm:$0xff] (%p313_p4)  ;;  %v1399_v49 = vmul.f32 (%p313_p4), %v1262_v44, %v1262_v44 }
 0x12e   : > { %v2723_v54 = vpop.f32.mrb[6].mxu0  ;;  %v2755_v55 = vpop.f32.mrb[6].mxu1  ;;  %1196 = vst [vmem:[#allocation2 + $0x20] sm:$0xff] %v889_v52  ;;  %1228 = vst [vmem:[#allocation2 + $0x120] sm:$0xff] %v1017_v53  ;;  %v1263_v45 = vld [vmem:[#allocation2 + $0x18] sm:$0xff] (%p313_p4)  ;;  %v1397_v47 = vmul.f32 (%p313_p4), %v1260_v42, %v1260_v42 }
 0x12f   : > { %v892_v56 = vpop.f32.mrb[7].mxu0  ;;  %v1020_v57 = vpop.f32.mrb[7].mxu1  ;;  %1199 = vst [vmem:[#allocation2 + $0x38] sm:$0xff] %v2723_v54  ;;  %1231 = vst [vmem:[#allocation2 + $0x138] sm:$0xff] %v2755_v55  ;;  %v1261_v43 = vld [vmem:[#allocation2 + $0x8] sm:$0xff] (%p313_p4)  ;;  %v1400_v52 = vmul.f32 (%p313_p4), %v1263_v45, %v1263_v45 }
 0x130   : > { %1197 = vst [vmem:[#allocation2 + $0x28] sm:$0xff] %v892_v56  ;;  %1229 = vst [vmem:[#allocation2 + $0x128] sm:$0xff] %v1020_v57  ;;  %v1325_v46 = vadd.f32 (%p313_p4), %v1261_v43, %v1260_v42  ;;  %v1398_v48 = vmul.f32 (%p313_p4), %v1261_v43, %v1261_v43 }
 0x132   : > { %v1326_v51 = vadd.f32 (%p313_p4), %v1325_v46, %v1262_v44  ;;  %v1461_v53 = vadd.f32 (%p313_p4), %v1398_v48, %v1397_v47 }
 0x134   : > { %v2726_v58 = vpop.f32.mrb[8].mxu0  ;;  %v2758_v59 = vpop.f32.mrb[8].mxu1  ;;  %v1327_v55 = vadd.f32 (%p313_p4), %v1326_v51, %v1263_v45  ;;  %v1462_v57 = vadd.f32 (%p313_p4), %v1461_v53, %v1399_v49 }
 0x135   : > { %v905_v60 = vpop.f32.mrb[9].mxu0  ;;  %v1033_v61 = vpop.f32.mrb[9].mxu1  ;;  %1202 = vst [vmem:[#allocation2 + $0x50] sm:$0xff] %v2726_v58  ;;  %1234 = vst [vmem:[#allocation2 + $0x150] sm:$0xff] %v2758_v59  ;;  %v1264_v50 = vld [vmem:[#allocation2 + $0x20] sm:$0xff] (%p313_p4)  ;;  %v1266_v58 = vld [vmem:[#allocation2 + $0x30] sm:$0xff] (%p313_p4) }
 0x136   : > { %v2727_v62 = vpop.f32.mrb[10].mxu0  ;;  %v2759_v63 = vpop.f32.mrb[10].mxu1  ;;  %1200 = vst [vmem:[#allocation2 + $0x40] sm:$0xff] %v905_v60  ;;  %1232 = vst [vmem:[#allocation2 + $0x140] sm:$0xff] %v1033_v61  ;;  %v1401_v56 = vmul.f32 (%p313_p4), %v1264_v50, %v1264_v50  ;;  %v1328_v59 = vadd.f32 (%p313_p4), %v1327_v55, %v1264_v50  ;;  %v1463_v61 = vadd.f32 (%p313_p4), %v1462_v57, %v1400_v52 }
 0x137   : > { %v908_v0 = vpop.f32.mrb[11].mxu0  ;;  %v1036_v1 = vpop.f32.mrb[11].mxu1  ;;  %1203 = vst [vmem:[#allocation2 + $0x58] sm:$0xff] %v2727_v62  ;;  %1235 = vst [vmem:[#allocation2 + $0x158] sm:$0xff] %v2759_v63  ;;  %v1265_v54 = vld [vmem:[#allocation2 + $0x28] sm:$0xff] (%p313_p4)  ;;  %v1267_v62 = vld [vmem:[#allocation2 + $0x38] sm:$0xff] (%p313_p4) }
 0x138   : > { %1201 = vst [vmem:[#allocation2 + $0x48] sm:$0xff] %v908_v0  ;;  %1233 = vst [vmem:[#allocation2 + $0x148] sm:$0xff] %v1036_v1  ;;  %v1402_v60 = vmul.f32 (%p313_p4), %v1265_v54, %v1265_v54  ;;  %v1329_v63 = vadd.f32 (%p313_p4), %v1328_v59, %v1265_v54  ;;  %v1403_v0 = vmul.f32 (%p313_p4), %v1266_v58, %v1266_v58 }
 0x139   : > { %v1464_v1 = vadd.f32 (%p313_p4), %v1463_v61, %v1401_v56 }
 0x13c   : > { %v2730_v2 = vpop.f32.mrb[12].mxu0  ;;  %v2762_v3 = vpop.f32.mrb[12].mxu1 }
 0x13d   : > { %v921_v4 = vpop.f32.mrb[13].mxu0  ;;  %v1049_v5 = vpop.f32.mrb[13].mxu1  ;;  %1206 = vst [vmem:[#allocation2 + $0x70] sm:$0xff] %v2730_v2  ;;  %1238 = vst [vmem:[#allocation2 + $0x170] sm:$0xff] %v2762_v3  ;;  %v1268_v2 = vld [vmem:[#allocation2 + $0x40] sm:$0xff] (%p313_p4)  ;;  %v1330_v3 = vadd.f32 (%p313_p4), %v1329_v63, %v1266_v58 }
 0x13e   : > { %v2731_v6 = vpop.f32.mrb[14].mxu0  ;;  %v2763_v7 = vpop.f32.mrb[14].mxu1  ;;  %1204 = vst [vmem:[#allocation2 + $0x60] sm:$0xff] %v921_v4  ;;  %1236 = vst [vmem:[#allocation2 + $0x160] sm:$0xff] %v1049_v5  ;;  %v1404_v4 = vmul.f32 (%p313_p4), %v1267_v62, %v1267_v62  ;;  %v1465_v5 = vadd.f32 (%p313_p4), %v1464_v1, %v1402_v60 }
 0x13f   : > { %v924_v8 = vpop.f32.mrb[15].mxu0  ;;  %v1052_v9 = vpop.f32.mrb[15].mxu1  ;;  %1207 = vst [vmem:[#allocation2 + $0x78] sm:$0xff] %v2731_v6  ;;  %1239 = vst [vmem:[#allocation2 + $0x178] sm:$0xff] %v2763_v7  ;;  %v1269_v6 = vld [vmem:[#allocation2 + $0x48] sm:$0xff] (%p313_p4)  ;;  %v1331_v7 = vadd.f32 (%p313_p4), %v1330_v3, %v1267_v62 }
 0x140   : > { %1205 = vst [vmem:[#allocation2 + $0x68] sm:$0xff] %v924_v8  ;;  %1237 = vst [vmem:[#allocation2 + $0x168] sm:$0xff] %v1052_v9  ;;  %v1405_v8 = vmul.f32 (%p313_p4), %v1268_v2, %v1268_v2  ;;  %v1466_v9 = vadd.f32 (%p313_p4), %v1465_v5, %v1403_v0 }
 0x144   : > { %v2734_v10 = vpop.f32.mrb[16].mxu0  ;;  %v2766_v11 = vpop.f32.mrb[16].mxu1 }
 0x145   : > { %v937_v12 = vpop.f32.mrb[17].mxu0  ;;  %v1065_v13 = vpop.f32.mrb[17].mxu1  ;;  %1210 = vst [vmem:[#allocation2 + $0x90] sm:$0xff] %v2734_v10  ;;  %1242 = vst [vmem:[#allocation2 + $0x190] sm:$0xff] %v2766_v11  ;;  %v1270_v10 = vld [vmem:[#allocation2 + $0x50] sm:$0xff] (%p313_p4)  ;;  %v1332_v11 = vadd.f32 (%p313_p4), %v1331_v7, %v1268_v2 }
 0x146   : > { %v2735_v14 = vpop.f32.mrb[18].mxu0  ;;  %v2767_v15 = vpop.f32.mrb[18].mxu1  ;;  %1208 = vst [vmem:[#allocation2 + $0x80] sm:$0xff] %v937_v12  ;;  %1240 = vst [vmem:[#allocation2 + $0x180] sm:$0xff] %v1065_v13  ;;  %v1406_v12 = vmul.f32 (%p313_p4), %v1269_v6, %v1269_v6  ;;  %v1467_v13 = vadd.f32 (%p313_p4), %v1466_v9, %v1404_v4 }
 0x147   : > { %v940_v16 = vpop.f32.mrb[19].mxu0  ;;  %v1068_v17 = vpop.f32.mrb[19].mxu1  ;;  %1211 = vst [vmem:[#allocation2 + $0x98] sm:$0xff] %v2735_v14  ;;  %1243 = vst [vmem:[#allocation2 + $0x198] sm:$0xff] %v2767_v15  ;;  %v1271_v14 = vld [vmem:[#allocation2 + $0x58] sm:$0xff] (%p313_p4)  ;;  %v1333_v15 = vadd.f32 (%p313_p4), %v1332_v11, %v1269_v6 }
 0x148   : > { %1209 = vst [vmem:[#allocation2 + $0x88] sm:$0xff] %v940_v16  ;;  %1241 = vst [vmem:[#allocation2 + $0x188] sm:$0xff] %v1068_v17  ;;  %v1407_v16 = vmul.f32 (%p313_p4), %v1270_v10, %v1270_v10  ;;  %v1468_v17 = vadd.f32 (%p313_p4), %v1467_v13, %v1405_v8 }
 0x14c   : > { %v2738_v18 = vpop.f32.mrb[20].mxu0  ;;  %v2770_v19 = vpop.f32.mrb[20].mxu1  ;;  %v1278_v42 = vld [vmem:[#allocation2 + $0x90] sm:$0xff] (%p313_p4) }
 0x14d   : > { %v953_v20 = vpop.f32.mrb[21].mxu0  ;;  %v1081_v21 = vpop.f32.mrb[21].mxu1  ;;  %1214 = vst [vmem:[#allocation2 + $0xb0] sm:$0xff] %v2738_v18  ;;  %1246 = vst [vmem:[#allocation2 + $0x1b0] sm:$0xff] %v2770_v19  ;;  %v1272_v18 = vld [vmem:[#allocation2 + $0x60] sm:$0xff] (%p313_p4)  ;;  %v1334_v19 = vadd.f32 (%p313_p4), %v1333_v15, %v1270_v10  ;;  %v1415_v48 = vmul.f32 (%p313_p4), %v1278_v42, %v1278_v42 }
 0x14e   : > { %v2739_v22 = vpop.f32.mrb[22].mxu0  ;;  %v2771_v23 = vpop.f32.mrb[22].mxu1  ;;  %1212 = vst [vmem:[#allocation2 + $0xa0] sm:$0xff] %v953_v20  ;;  %1244 = vst [vmem:[#allocation2 + $0x1a0] sm:$0xff] %v1081_v21  ;;  %v1408_v20 = vmul.f32 (%p313_p4), %v1271_v14, %v1271_v14  ;;  %v1469_v21 = vadd.f32 (%p313_p4), %v1468_v17, %v1406_v12  ;;  %v1279_v46 = vld [vmem:[#allocation2 + $0x98] sm:$0xff] (%p313_p4) }
 0x14f   : > { %v956_v24 = vpop.f32.mrb[23].mxu0  ;;  %v1084_v25 = vpop.f32.mrb[23].mxu1  ;;  %1215 = vst [vmem:[#allocation2 + $0xb8] sm:$0xff] %v2739_v22  ;;  %1247 = vst [vmem:[#allocation2 + $0x1b8] sm:$0xff] %v2771_v23  ;;  %v1273_v22 = vld [vmem:[#allocation2 + $0x68] sm:$0xff] (%p313_p4)  ;;  %v1335_v23 = vadd.f32 (%p313_p4), %v1334_v19, %v1271_v14  ;;  %v1416_v52 = vmul.f32 (%p313_p4), %v1279_v46, %v1279_v46 }
 0x150   : > { %1213 = vst [vmem:[#allocation2 + $0xa8] sm:$0xff] %v956_v24  ;;  %1245 = vst [vmem:[#allocation2 + $0x1a8] sm:$0xff] %v1084_v25  ;;  %v1409_v24 = vmul.f32 (%p313_p4), %v1272_v18, %v1272_v18  ;;  %v1470_v25 = vadd.f32 (%p313_p4), %v1469_v21, %v1407_v16 }
 0x154   : > { %v2742_v26 = vpop.f32.mrb[24].mxu0  ;;  %v2774_v27 = vpop.f32.mrb[24].mxu1  ;;  %v1282_v58 = vld [vmem:[#allocation2 + $0xb0] sm:$0xff] (%p313_p4) }
 0x155   : > { %v969_v28 = vpop.f32.mrb[25].mxu0  ;;  %v1097_v29 = vpop.f32.mrb[25].mxu1  ;;  %1218 = vst [vmem:[#allocation2 + $0xd0] sm:$0xff] %v2742_v26  ;;  %1250 = vst [vmem:[#allocation2 + $0x1d0] sm:$0xff] %v2774_v27  ;;  %v1274_v26 = vld [vmem:[#allocation2 + $0x70] sm:$0xff] (%p313_p4)  ;;  %v1336_v27 = vadd.f32 (%p313_p4), %v1335_v23, %v1272_v18  ;;  %v1280_v50 = vld [vmem:[#allocation2 + $0xa0] sm:$0xff] (%p313_p4)  ;;  %v1419_v0 = vmul.f32 (%p313_p4), %v1282_v58, %v1282_v58 }
 0x156   : > { %v2743_v30 = vpop.f32.mrb[26].mxu0  ;;  %v2775_v31 = vpop.f32.mrb[26].mxu1  ;;  %1216 = vst [vmem:[#allocation2 + $0xc0] sm:$0xff] %v969_v28  ;;  %1248 = vst [vmem:[#allocation2 + $0x1c0] sm:$0xff] %v1097_v29  ;;  %v1410_v28 = vmul.f32 (%p313_p4), %v1273_v22, %v1273_v22  ;;  %v1471_v29 = vadd.f32 (%p313_p4), %v1470_v25, %v1408_v20  ;;  %v1417_v56 = vmul.f32 (%p313_p4), %v1280_v50, %v1280_v50  ;;  %v1283_v62 = vld [vmem:[#allocation2 + $0xb8] sm:$0xff] (%p313_p4) }
 0x157   : > { %v972_v32 = vpop.f32.mrb[27].mxu0  ;;  %v1100_v33 = vpop.f32.mrb[27].mxu1  ;;  %1219 = vst [vmem:[#allocation2 + $0xd8] sm:$0xff] %v2743_v30  ;;  %1251 = vst [vmem:[#allocation2 + $0x1d8] sm:$0xff] %v2775_v31  ;;  %v1275_v30 = vld [vmem:[#allocation2 + $0x78] sm:$0xff] (%p313_p4)  ;;  %v1337_v31 = vadd.f32 (%p313_p4), %v1336_v27, %v1273_v22  ;;  %v1281_v54 = vld [vmem:[#allocation2 + $0xa8] sm:$0xff] (%p313_p4)  ;;  %v1420_v4 = vmul.f32 (%p313_p4), %v1283_v62, %v1283_v62 }
 0x158   : > { %1217 = vst [vmem:[#allocation2 + $0xc8] sm:$0xff] %v972_v32  ;;  %1249 = vst [vmem:[#allocation2 + $0x1c8] sm:$0xff] %v1100_v33  ;;  %v1411_v32 = vmul.f32 (%p313_p4), %v1274_v26, %v1274_v26  ;;  %v1472_v33 = vadd.f32 (%p313_p4), %v1471_v29, %v1409_v24  ;;  %v1418_v60 = vmul.f32 (%p313_p4), %v1281_v54, %v1281_v54 }
 0x15a   : > { %1259 = sbr.rel (!%p313_p4) target bundleno = 467 (0x1d3), region = 48 }
 0x15c   : > { %v2746_v34 = vpop.f32.mrb[28].mxu0  ;;  %v2778_v35 = vpop.f32.mrb[28].mxu1  ;;  %v1286_v10 = vld [vmem:[#allocation2 + $0xd0] sm:$0xff] (%p313_p4) }
 0x15d   : > { %v985_v36 = vpop.f32.mrb[29].mxu0  ;;  %v1113_v37 = vpop.f32.mrb[29].mxu1  ;;  %1222 = vst [vmem:[#allocation2 + $0xf0] sm:$0xff] %v2746_v34  ;;  %1254 = vst [vmem:[#allocation2 + $0x1f0] sm:$0xff] %v2778_v35  ;;  %v1276_v34 = vld [vmem:[#allocation2 + $0x80] sm:$0xff] (%p313_p4)  ;;  %v1338_v35 = vadd.f32 (%p313_p4), %v1337_v31, %v1274_v26  ;;  %v1423_v16 = vmul.f32 (%p313_p4), %v1286_v10, %v1286_v10 }
 0x15e   : > { %v2747_v38 = vpop.f32.mrb[30].mxu0  ;;  %v2779_v39 = vpop.f32.mrb[30].mxu1  ;;  %1220 = vst [vmem:[#allocation2 + $0xe0] sm:$0xff] %v985_v36  ;;  %1252 = vst [vmem:[#allocation2 + $0x1e0] sm:$0xff] %v1113_v37  ;;  %v1412_v36 = vmul.f32 (%p313_p4), %v1275_v30, %v1275_v30  ;;  %v1473_v37 = vadd.f32 (%p313_p4), %v1472_v33, %v1410_v28  ;;  %v1284_v2 = vld [vmem:[#allocation2 + $0xc0] sm:$0xff] (%p313_p4)  ;;  %v1287_v14 = vld [vmem:[#allocation2 + $0xd8] sm:$0xff] (%p313_p4) }
 0x15f   : > { %v988_v40 = vpop.f32.mrb[31].mxu0  ;;  %v1116_v41 = vpop.f32.mrb[31].mxu1  ;;  %1223 = vst [vmem:[#allocation2 + $0xf8] sm:$0xff] %v2747_v38  ;;  %1255 = vst [vmem:[#allocation2 + $0x1f8] sm:$0xff] %v2779_v39  ;;  %v1277_v38 = vld [vmem:[#allocation2 + $0x88] sm:$0xff] (%p313_p4)  ;;  %v1339_v39 = vadd.f32 (%p313_p4), %v1338_v35, %v1275_v30  ;;  %v1421_v8 = vmul.f32 (%p313_p4), %v1284_v2, %v1284_v2  ;;  %v1424_v20 = vmul.f32 (%p313_p4), %v1287_v14, %v1287_v14 }
 0x160   : > { %1221 = vst [vmem:[#allocation2 + $0xe8] sm:$0xff] %v988_v40  ;;  %1253 = vst [vmem:[#allocation2 + $0x1e8] sm:$0xff] %v1116_v41  ;;  %v1413_v40 = vmul.f32 (%p313_p4), %v1276_v34, %v1276_v34  ;;  %v1474_v41 = vadd.f32 (%p313_p4), %v1473_v37, %v1411_v32  ;;  %v1414_v44 = vmul.f32 (%p313_p4), %v1277_v38, %v1277_v38  ;;  %v1285_v6 = vld [vmem:[#allocation2 + $0xc8] sm:$0xff] (%p313_p4) }
 0x161   : > { %v1340_v43 = vadd.f32 %v1339_v39, %v1276_v34  ;;  %v1422_v12 = vmul.f32 %v1285_v6, %v1285_v6  ;;  %v1292_v34 = vld [vmem:[#allocation2 + $0x100] sm:$0xff] }
 0x162   : > { %v1475_v45 = vadd.f32 %v1474_v41, %v1412_v36 }
 0x163   : > { %v1341_v47 = vadd.f32 %v1340_v43, %v1277_v38  ;;  %v1293_v38 = vld [vmem:[#allocation2 + $0x108] sm:$0xff] }
 0x164   : > { %v1476_v49 = vadd.f32 %v1475_v45, %v1413_v40  ;;  %v1290_v26 = vld [vmem:[#allocation2 + $0xf0] sm:$0xff]  ;;  %v1429_v40 = vmul.f32 %v1292_v34, %v1292_v34 }
 0x165   : > { %v1342_v51 = vadd.f32 %v1341_v47, %v1278_v42  ;;  %v1288_v18 = vld [vmem:[#allocation2 + $0xe0] sm:$0xff]  ;;  %v1427_v32 = vmul.f32 %v1290_v26, %v1290_v26  ;;  %v1294_v42 = vld [vmem:[#allocation2 + $0x110] sm:$0xff] }
 0x166   : > { %v1477_v53 = vadd.f32 %v1476_v49, %v1414_v44  ;;  %v1425_v24 = vmul.f32 %v1288_v18, %v1288_v18  ;;  %v1291_v30 = vld [vmem:[#allocation2 + $0xf8] sm:$0xff]  ;;  %v1430_v44 = vmul.f32 %v1293_v38, %v1293_v38 }
 0x167   : > { %v1343_v55 = vadd.f32 %v1342_v51, %v1279_v46  ;;  %v1289_v22 = vld [vmem:[#allocation2 + $0xe8] sm:$0xff]  ;;  %v1428_v36 = vmul.f32 %v1291_v30, %v1291_v30  ;;  %v1295_v46 = vld [vmem:[#allocation2 + $0x118] sm:$0xff] }
 0x168   : > { %v1478_v57 = vadd.f32 %v1477_v53, %v1415_v48  ;;  %v1426_v28 = vmul.f32 %v1289_v22, %v1289_v22  ;;  %v1431_v48 = vmul.f32 %v1294_v42, %v1294_v42 }
 0x169   : > { %v1344_v59 = vadd.f32 %v1343_v55, %v1280_v50  ;;  %v1296_v50 = vld [vmem:[#allocation2 + $0x120] sm:$0xff] }
 0x16a   : > { %v1479_v61 = vadd.f32 %v1478_v57, %v1416_v52  ;;  %v1432_v52 = vmul.f32 %v1295_v46, %v1295_v46 }
 0x16b   : > { %v1345_v63 = vadd.f32 %v1344_v59, %v1281_v54  ;;  %v1297_v54 = vld [vmem:[#allocation2 + $0x128] sm:$0xff] }
 0x16c   : > { %v1480_v1 = vadd.f32 %v1479_v61, %v1417_v56  ;;  %v1433_v56 = vmul.f32 %v1296_v50, %v1296_v50 }
 0x16d   : > { %v1346_v3 = vadd.f32 %v1345_v63, %v1282_v58  ;;  %v1298_v58 = vld [vmem:[#allocation2 + $0x130] sm:$0xff] }
 0x16e   : > { %v1481_v5 = vadd.f32 %v1480_v1, %v1418_v60  ;;  %v1434_v60 = vmul.f32 %v1297_v54, %v1297_v54 }
 0x16f   : > { %v1347_v7 = vadd.f32 %v1346_v3, %v1283_v62  ;;  %v1299_v62 = vld [vmem:[#allocation2 + $0x138] sm:$0xff] }
 0x170   : > { %v1482_v9 = vadd.f32 %v1481_v5, %v1419_v0  ;;  %v1435_v0 = vmul.f32 %v1298_v58, %v1298_v58 }
 0x171   : > { %v1348_v11 = vadd.f32 %v1347_v7, %v1284_v2  ;;  %v1300_v2 = vld [vmem:[#allocation2 + $0x140] sm:$0xff] }
 0x172   : > { %v1483_v13 = vadd.f32 %v1482_v9, %v1420_v4  ;;  %v1436_v4 = vmul.f32 %v1299_v62, %v1299_v62 }
 0x173   : > { %v1349_v15 = vadd.f32 %v1348_v11, %v1285_v6  ;;  %v1301_v6 = vld [vmem:[#allocation2 + $0x148] sm:$0xff] }
 0x174   : > { %v1484_v17 = vadd.f32 %v1483_v13, %v1421_v8  ;;  %v1437_v8 = vmul.f32 %v1300_v2, %v1300_v2 }
 0x175   : > { %v1350_v19 = vadd.f32 %v1349_v15, %v1286_v10  ;;  %v1302_v10 = vld [vmem:[#allocation2 + $0x150] sm:$0xff] }
 0x176   : > { %v1485_v21 = vadd.f32 %v1484_v17, %v1422_v12  ;;  %v1438_v12 = vmul.f32 %v1301_v6, %v1301_v6 }
 0x177   : > { %v1351_v23 = vadd.f32 %v1350_v19, %v1287_v14  ;;  %v1303_v14 = vld [vmem:[#allocation2 + $0x158] sm:$0xff] }
 0x178   : > { %v1486_v25 = vadd.f32 %v1485_v21, %v1423_v16  ;;  %v1439_v16 = vmul.f32 %v1302_v10, %v1302_v10 }
 0x179   : > { %v1352_v27 = vadd.f32 %v1351_v23, %v1288_v18  ;;  %v1304_v18 = vld [vmem:[#allocation2 + $0x160] sm:$0xff] }
 0x17a   : > { %v1487_v29 = vadd.f32 %v1486_v25, %v1424_v20  ;;  %v1440_v20 = vmul.f32 %v1303_v14, %v1303_v14 }
 0x17b   : > { %v1353_v31 = vadd.f32 %v1352_v27, %v1289_v22  ;;  %v1305_v22 = vld [vmem:[#allocation2 + $0x168] sm:$0xff] }
 0x17c   : > { %v1488_v33 = vadd.f32 %v1487_v29, %v1425_v24  ;;  %v1441_v24 = vmul.f32 %v1304_v18, %v1304_v18 }
 0x17d   : > { %v1354_v35 = vadd.f32 %v1353_v31, %v1290_v26  ;;  %v1306_v26 = vld [vmem:[#allocation2 + $0x170] sm:$0xff] }
 0x17e   : > { %v1489_v37 = vadd.f32 %v1488_v33, %v1426_v28  ;;  %v1442_v28 = vmul.f32 %v1305_v22, %v1305_v22 }
 0x17f   : > { %v1355_v39 = vadd.f32 %v1354_v35, %v1291_v30  ;;  %v1307_v30 = vld [vmem:[#allocation2 + $0x178] sm:$0xff] }
 0x180   : > { %v1490_v41 = vadd.f32 %v1489_v37, %v1427_v32  ;;  %v1443_v32 = vmul.f32 %v1306_v26, %v1306_v26 }
 0x181   : > { %v1356_v43 = vadd.f32 %v1355_v39, %v1292_v34  ;;  %v1308_v34 = vld [vmem:[#allocation2 + $0x180] sm:$0xff] }
 0x182   : > { %v1491_v45 = vadd.f32 %v1490_v41, %v1428_v36  ;;  %v1444_v36 = vmul.f32 %v1307_v30, %v1307_v30 }
 0x183   : > { %v1357_v47 = vadd.f32 %v1356_v43, %v1293_v38  ;;  %v1309_v38 = vld [vmem:[#allocation2 + $0x188] sm:$0xff] }
 0x184   : > { %v1492_v49 = vadd.f32 %v1491_v45, %v1429_v40  ;;  %v1445_v40 = vmul.f32 %v1308_v34, %v1308_v34 }
 0x185   : > { %v1358_v51 = vadd.f32 %v1357_v47, %v1294_v42  ;;  %v1310_v42 = vld [vmem:[#allocation2 + $0x190] sm:$0xff] }
 0x186   : > { %v1493_v53 = vadd.f32 %v1492_v49, %v1430_v44  ;;  %v1446_v44 = vmul.f32 %v1309_v38, %v1309_v38 }
 0x187   : > { %v1359_v55 = vadd.f32 %v1358_v51, %v1295_v46  ;;  %v1311_v46 = vld [vmem:[#allocation2 + $0x198] sm:$0xff] }
 0x188   : > { %v1494_v57 = vadd.f32 %v1493_v53, %v1431_v48  ;;  %v1447_v48 = vmul.f32 %v1310_v42, %v1310_v42 }
 0x189   : > { %v1360_v59 = vadd.f32 %v1359_v55, %v1296_v50  ;;  %v1312_v50 = vld [vmem:[#allocation2 + $0x1a0] sm:$0xff] }
 0x18a   : > { %v1495_v61 = vadd.f32 %v1494_v57, %v1432_v52  ;;  %v1448_v52 = vmul.f32 %v1311_v46, %v1311_v46 }
 0x18b   : > { %v1361_v63 = vadd.f32 %v1360_v59, %v1297_v54  ;;  %v1313_v54 = vld [vmem:[#allocation2 + $0x1a8] sm:$0xff] }
 0x18c   : > { %v1496_v1 = vadd.f32 %v1495_v61, %v1433_v56  ;;  %v1449_v56 = vmul.f32 %v1312_v50, %v1312_v50 }
 0x18d   : > { %v1362_v3 = vadd.f32 %v1361_v63, %v1298_v58  ;;  %v1314_v58 = vld [vmem:[#allocation2 + $0x1b0] sm:$0xff] }
 0x18e   : > { %v1497_v5 = vadd.f32 %v1496_v1, %v1434_v60  ;;  %v1450_v60 = vmul.f32 %v1313_v54, %v1313_v54 }
 0x18f   : > { %v1363_v7 = vadd.f32 %v1362_v3, %v1299_v62  ;;  %v1315_v62 = vld [vmem:[#allocation2 + $0x1b8] sm:$0xff] }
 0x190   : > { %v1498_v9 = vadd.f32 %v1497_v5, %v1435_v0  ;;  %v1451_v0 = vmul.f32 %v1314_v58, %v1314_v58 }
 0x191   : > { %v1364_v11 = vadd.f32 %v1363_v7, %v1300_v2  ;;  %v1316_v2 = vld [vmem:[#allocation2 + $0x1c0] sm:$0xff] }
 0x192   : > { %v1499_v13 = vadd.f32 %v1498_v9, %v1436_v4  ;;  %v1452_v4 = vmul.f32 %v1315_v62, %v1315_v62 }
 0x193   : > { %v1365_v15 = vadd.f32 %v1364_v11, %v1301_v6  ;;  %v1317_v6 = vld [vmem:[#allocation2 + $0x1c8] sm:$0xff] }
 0x194   : > { %v1500_v17 = vadd.f32 %v1499_v13, %v1437_v8  ;;  %v1453_v8 = vmul.f32 %v1316_v2, %v1316_v2 }
 0x195   : > { %v1366_v19 = vadd.f32 %v1365_v15, %v1302_v10  ;;  %v1318_v10 = vld [vmem:[#allocation2 + $0x1d0] sm:$0xff] }
 0x196   : > { %v1501_v21 = vadd.f32 %v1500_v17, %v1438_v12  ;;  %v1454_v12 = vmul.f32 %v1317_v6, %v1317_v6 }
 0x197   : > { %v1367_v23 = vadd.f32 %v1366_v19, %v1303_v14  ;;  %v1319_v14 = vld [vmem:[#allocation2 + $0x1d8] sm:$0xff] }
 0x198   : > { %v1502_v25 = vadd.f32 %v1501_v21, %v1439_v16  ;;  %v1455_v16 = vmul.f32 %v1318_v10, %v1318_v10 }
 0x199   : > { %v1368_v27 = vadd.f32 %v1367_v23, %v1304_v18  ;;  %v1320_v18 = vld [vmem:[#allocation2 + $0x1e0] sm:$0xff] }
 0x19a   : > { %v1503_v29 = vadd.f32 %v1502_v25, %v1440_v20  ;;  %v1456_v20 = vmul.f32 %v1319_v14, %v1319_v14 }
 0x19b   : > { %v1369_v31 = vadd.f32 %v1368_v27, %v1305_v22  ;;  %v1321_v22 = vld [vmem:[#allocation2 + $0x1e8] sm:$0xff] }
 0x19c   : > { %v1504_v33 = vadd.f32 %v1503_v29, %v1441_v24  ;;  %v1457_v24 = vmul.f32 %v1320_v18, %v1320_v18 }
 0x19d   : > { %v1370_v35 = vadd.f32 %v1369_v31, %v1306_v26  ;;  %v1322_v26 = vld [vmem:[#allocation2 + $0x1f0] sm:$0xff] }
 0x19e   : > { %v1505_v37 = vadd.f32 %v1504_v33, %v1442_v28  ;;  %v1458_v28 = vmul.f32 %v1321_v22, %v1321_v22 }
 0x19f   : > { %v1371_v39 = vadd.f32 %v1370_v35, %v1307_v30  ;;  %v1323_v30 = vld [vmem:[#allocation2 + $0x1f8] sm:$0xff] }
 0x1a0   : > { %v1506_v41 = vadd.f32 %v1505_v37, %v1443_v32  ;;  %v1459_v32 = vmul.f32 %v1322_v26, %v1322_v26  ;;  %v1460_v35 = vmul.f32 %v1323_v30, %v1323_v30 }
 0x1a1   : > { %v1372_v43 = vadd.f32 %v1371_v39, %v1308_v34 }
 0x1a2   : > { %v1507_v45 = vadd.f32 %v1506_v41, %v1444_v36 }
 0x1a3   : > { %v1373_v47 = vadd.f32 %v1372_v43, %v1309_v38 }
 0x1a4   : > { %v1508_v49 = vadd.f32 %v1507_v45, %v1445_v40 }
 0x1a5   : > { %v1374_v51 = vadd.f32 %v1373_v47, %v1310_v42 }
 0x1a6   : > { %v1509_v53 = vadd.f32 %v1508_v49, %v1446_v44 }
 0x1a7   : > { %v1375_v55 = vadd.f32 %v1374_v51, %v1311_v46 }
 0x1a8   : > { %v1510_v57 = vadd.f32 %v1509_v53, %v1447_v48  ;;  %v1324_v48 = vld [vmem:[#allocation3] sm:$0x1]  ;;  %v1396_v53 = vld [vmem:[#allocation4] sm:$0x1] }
 0x1a9   : > { %v1376_v59 = vadd.f32 %v1375_v55, %v1312_v50 }
 0x1aa   : > { %v1511_v61 = vadd.f32 %v1510_v57, %v1448_v52 }
 0x1ab   : > { %v1377_v63 = vadd.f32 %v1376_v59, %v1313_v54 }
 0x1ac   : > { %v1512_v1 = vadd.f32 %v1511_v61, %v1449_v56 }
 0x1ad   : > { %v1378_v3 = vadd.f32 %v1377_v63, %v1314_v58 }
 0x1ae   : > { %v1513_v5 = vadd.f32 %v1512_v1, %v1450_v60 }
 0x1af   : > { %v1379_v7 = vadd.f32 %v1378_v3, %v1315_v62 }
 0x1b0   : > { %v1514_v9 = vadd.f32 %v1513_v5, %v1451_v0 }
 0x1b1   : > { %v1380_v11 = vadd.f32 %v1379_v7, %v1316_v2 }
 0x1b2   : > { %v1515_v13 = vadd.f32 %v1514_v9, %v1452_v4 }
 0x1b3   : > { %v1381_v15 = vadd.f32 %v1380_v11, %v1317_v6 }
 0x1b4   : > { %v1516_v17 = vadd.f32 %v1515_v13, %v1453_v8 }
 0x1b5   : > { %v1382_v19 = vadd.f32 %v1381_v15, %v1318_v10 }
 0x1b6   : > { %v1517_v21 = vadd.f32 %v1516_v17, %v1454_v12 }
 0x1b7   : > { %v1383_v23 = vadd.f32 %v1382_v19, %v1319_v14 }
 0x1b8   : > { %v1518_v25 = vadd.f32 %v1517_v21, %v1455_v16 }
 0x1b9   : > { %v1384_v27 = vadd.f32 %v1383_v23, %v1320_v18 }
 0x1ba   : > { %v1519_v29 = vadd.f32 %v1518_v25, %v1456_v20 }
 0x1bb   : > { %v1385_v31 = vadd.f32 %v1384_v27, %v1321_v22 }
 0x1bc   : > { %v1520_v33 = vadd.f32 %v1519_v29, %v1457_v24 }
 0x1bd   : > { %v1386_v34 = vadd.f32 %v1385_v31, %v1322_v26 }
 0x1be   : > { %v1521_v36 = vadd.f32 %v1520_v33, %v1458_v28 }
 0x1bf   : > { %v1387_v37 = vadd.f32 %v1386_v34, %v1323_v30 }
 0x1c0   : > { %v1522_v38 = vadd.f32 %v1521_v36, %v1459_v32 }
 0x1c1   : > { %v1388_v39 = vrot.slane %v1387_v37, 4 }
 0x1c2   : > { %v1523_v40 = vadd.f32 %v1522_v38, %v1460_v35 }
 0x1c3   : > { %v1389_v41 = vadd.f32 %v1388_v39, %v1387_v37 }
 0x1c4   : > { %v1524_v42 = vrot.slane %v1523_v40, 4 }
 0x1c5   : > { %v1390_v43 = vrot.slane %v1389_v41, 2 }
 0x1c6   : > { %v1525_v44 = vadd.f32 %v1524_v42, %v1523_v40 }
 0x1c7   : > { %v1391_v45 = vadd.f32 %v1390_v43, %v1389_v41 }
 0x1c8   : > { %v1526_v46 = vrot.slane %v1525_v44, 2 }
 0x1c9   : > { %v1392_v47 = vrot.slane %v1391_v45, 1 }
 0x1ca   : > { %v1527_v49 = vadd.f32 %v1526_v46, %v1525_v44 }
 0x1cb   : > { %v1393_v50 = vadd.f32 %v1392_v47, %v1391_v45 }
 0x1cc   : > { %v1528_v51 = vrot.slane %v1527_v49, 1 }
 0x1cd   : > { %v1394_v52 = vadd.f32 %v1393_v50, %v1324_v48 }
 0x1ce   : > { %v1529_v54 = vadd.f32 %v1528_v51, %v1527_v49 }
 0x1cf   : > { %1395 = vst [vmem:[#allocation3] sm:$0x1] %v1394_v52 }
 0x1d0   : > { %v1530_v55 = vadd.f32 %v1529_v54, %v1396_v53 }
 0x1d2   : > { %1531 = vst [vmem:[#allocation4] sm:$0x1] %v1530_v55 }
 0x1d3 PF: > { %p1532_p5 = scmp.eq.s32.totalorder %s2879_s15, 1 }
 0x1d4   : > { %v1544_v0 = vld [vmem:[%s3567_s2] sm:$0x1] (%p1532_p5) }
 0x1d5   : > { %1536 = sbr.rel (!%p1532_p5) target bundleno = 500 (0x1f4), region = 52  ;;  %v1549_v3 = vld [vmem:[%s3568_s3] sm:$0x1] (%p1532_p5) }
 0x1d6   : > { %v1537_v56 = vld [vmem:[#allocation3] sm:$0x1] (%p1532_p5) }
 0x1d7   : > { %v1538_v58 = vmul.f32 (%p1532_p5), 0.001953125, %v1537_v56 }
 0x1d9   : > { %v1539_v57 = vld [vmem:[#allocation4] sm:$0x1] (%p1532_p5)  ;;  %v1541_v60 = vmul.f32 (%p1532_p5), %v1538_v58, %v1538_v58 }
 0x1da   : > { %v1540_v59 = vmul.f32 (%p1532_p5), 0.001953125, %v1539_v57 }
 0x1dc   : > { %v1542_v61 = vsub.f32 %v1540_v59, %v1541_v60 }
 0x1de   : > { %v1543_v62 = vmax.f32 %v1542_v61, 0.0 }
 0x1e0   : > { %v1545_v63 = vadd.f32 1e-05, %v1543_v62 }
 0x1e2   : > { %2863 = vrsqrt.f32 %v1545_v63 }
 0x1ec   : > { %v2864_v1 = vpop.eup %2863 }
 0x1ed   : > { %v1547_v2 = vmul.f32 %v2864_v1, %v1544_v0 }
 0x1ef   : > { %1548 = vst [vmem:[#allocation5] sm:$0x1] %v1547_v2  ;;  %v1550_v4 = vmul.f32 %v1547_v2, %v1538_v58 }
 0x1f1   : > { %v1551_v5 = vsub.f32 %v1549_v3, %v1550_v4 }
 0x1f3   : > { %1552 = vst [vmem:[#allocation6] sm:$0x1] %v1551_v5 }
 0x1f4 PF: > { %1556 = sbr.rel (!%p1532_p5) target bundleno = 564 (0x234), region = 56  ;;  %v1557_v6 = vld [vmem:[#allocation2] sm:$0xff] (%p1532_p5)  ;;  %v1558_v7 = vld [vmem:[#allocation2 + $0x8] sm:$0xff] (%p1532_p5)  ;;  %v1559_v12 = vld [vmem:[#allocation2 + $0x10] sm:$0xff] (%p1532_p5) }
 0x1f5   : > { %v1560_v13 = vld [vmem:[#allocation2 + $0x18] sm:$0xff] (%p1532_p5)  ;;  %v1561_v16 = vld [vmem:[#allocation2 + $0x20] sm:$0xff] (%p1532_p5)  ;;  %v1562_v17 = vld [vmem:[#allocation2 + $0x28] sm:$0xff] (%p1532_p5) }
 0x1f6   : > { %v3328_v8 = vld [vmem:[#allocation5] ss:$0 sm:$0xff] (%p1532_p5)  ;;  %v1563_v18 = vld [vmem:[#allocation2 + $0x30] sm:$0xff] (%p1532_p5)  ;;  %v1564_v23 = vld [vmem:[#allocation2 + $0x38] sm:$0xff] (%p1532_p5) }
 0x1f7   : > { %v1628_v9 = vmul.f32 (%p1532_p5), %v3328_v8, %v1557_v6  ;;  %v1629_v10 = vmul.f32 (%p1532_p5), %v3328_v8, %v1558_v7  ;;  %v1630_v14 = vmul.f32 (%p1532_p5), %v3328_v8, %v1559_v12  ;;  %v1631_v15 = vmul.f32 (%p1532_p5), %v3328_v8, %v1560_v13  ;;  %v1565_v28 = vld [vmem:[#allocation2 + $0x40] sm:$0xff] (%p1532_p5)  ;;  %v1566_v33 = vld [vmem:[#allocation2 + $0x48] sm:$0xff] (%p1532_p5)  ;;  %v1567_v38 = vld [vmem:[#allocation2 + $0x50] sm:$0xff] (%p1532_p5) }
 0x1f8   : > { %v1632_v21 = vmul.f32 (%p1532_p5), %v3328_v8, %v1561_v16  ;;  %v1633_v22 = vmul.f32 (%p1532_p5), %v3328_v8, %v1562_v17  ;;  %v1634_v26 = vmul.f32 (%p1532_p5), %v3328_v8, %v1563_v18  ;;  %v1635_v27 = vmul.f32 (%p1532_p5), %v3328_v8, %v1564_v23  ;;  %v1568_v39 = vld [vmem:[#allocation2 + $0x58] sm:$0xff] (%p1532_p5)  ;;  %v1569_v44 = vld [vmem:[#allocation2 + $0x60] sm:$0xff] (%p1532_p5)  ;;  %v1570_v45 = vld [vmem:[#allocation2 + $0x68] sm:$0xff] (%p1532_p5) }
 0x1f9   : > { %v1636_v43 = vmul.f32 (%p1532_p5), %v3328_v8, %v1565_v28  ;;  %v1637_v49 = vmul.f32 (%p1532_p5), %v3328_v8, %v1566_v33  ;;  %v1571_v50 = vld [vmem:[#allocation2 + $0x70] sm:$0xff] (%p1532_p5)  ;;  %v1638_v53 = vmul.f32 (%p1532_p5), %v3328_v8, %v1567_v38  ;;  %v1639_v54 = vmul.f32 (%p1532_p5), %v3328_v8, %v1568_v39  ;;  %v1572_v55 = vld [vmem:[#allocation2 + $0x78] sm:$0xff] (%p1532_p5)  ;;  %v1573_v60 = vld [vmem:[#allocation2 + $0x80] sm:$0xff] (%p1532_p5) }
 0x1fa   : > { %v3332_v11 = vld [vmem:[#allocation6] ss:$0 sm:$0xff] (%p1532_p5)  ;;  %v1640_v58 = vmul.f32 (%p1532_p5), %v3328_v8, %v1569_v44  ;;  %v1641_v59 = vmul.f32 (%p1532_p5), %v3328_v8, %v1570_v45  ;;  %v1642_v0 = vmul.f32 (%p1532_p5), %v3328_v8, %v1571_v50  ;;  %v1643_v4 = vmul.f32 (%p1532_p5), %v3328_v8, %v1572_v55  ;;  %v1574_v5 = vld [vmem:[#allocation2 + $0x88] sm:$0xff] (%p1532_p5)  ;;  %v1575_v12 = vld [vmem:[#allocation2 + $0x90] sm:$0xff] (%p1532_p5) }
 0x1fb   : > { %v1699_v19 = vadd.f32 %v3332_v11, %v1628_v9  ;;  %v1700_v20 = vadd.f32 %v3332_v11, %v1629_v10  ;;  %v1701_v24 = vadd.f32 %v3332_v11, %v1630_v14  ;;  %v1702_v25 = vadd.f32 %v3332_v11, %v1631_v15  ;;  %v1576_v13 = vld [vmem:[#allocation2 + $0x98] sm:$0xff]  ;;  %v1577_v18 = vld [vmem:[#allocation2 + $0xa0] sm:$0xff]  ;;  %v1586_v55 = vld [vmem:[#allocation2 + $0xe8] sm:$0xff] }
 0x1fc   : > { %v1703_v31 = vadd.f32 %v3332_v11, %v1632_v21  ;;  %v1704_v32 = vadd.f32 %v3332_v11, %v1633_v22  ;;  %v1705_v36 = vadd.f32 %v3332_v11, %v1634_v26  ;;  %v1706_v37 = vadd.f32 %v3332_v11, %v1635_v27 }
 0x1fd   : > { %v1763_v29 = vmax.f32 %v1699_v19, 0.0  ;;  %v1764_v30 = vmax.f32 %v1700_v20, 0.0  ;;  %v1765_v34 = vmax.f32 %v1701_v24, 0.0  ;;  %v1766_v35 = vmax.f32 %v1702_v25, 0.0  ;;  %v1578_v19 = vld [vmem:[#allocation2 + $0xa8] sm:$0xff]  ;;  %v1579_v24 = vld [vmem:[#allocation2 + $0xb0] sm:$0xff] }
 0x1fe   : > { %v1767_v41 = vmax.f32 %v1703_v31, 0.0  ;;  %v1768_v42 = vmax.f32 %v1704_v32, 0.0  ;;  %v1769_v47 = vmax.f32 %v1705_v36, 0.0  ;;  %v1770_v48 = vmax.f32 %v1706_v37, 0.0 }
 0x1ff   : > { %v2472_v40 = vpack.c.bf16 %v1764_v30, %v1763_v29  ;;  %v2477_v46 = vpack.c.bf16 %v1766_v35, %v1765_v34  ;;  %v1707_v52 = vadd.f32 %v3332_v11, %v1636_v43  ;;  %v1708_v57 = vadd.f32 %v3332_v11, %v1637_v49  ;;  %v1580_v29 = vld [vmem:[#allocation2 + $0xb8] sm:$0xff]  ;;  %v1581_v34 = vld [vmem:[#allocation2 + $0xc0] sm:$0xff]  ;;  %v1582_v43 = vld [vmem:[#allocation2 + $0xc8] sm:$0xff] }
 0x200   : > { %v2482_v51 = vpack.c.bf16 %v1768_v42, %v1767_v41  ;;  %v2487_v56 = vpack.c.bf16 %v1770_v48, %v1769_v47  ;;  %v1709_v62 = vadd.f32 %v3332_v11, %v1638_v53  ;;  %v1710_v63 = vadd.f32 %v3332_v11, %v1639_v54  ;;  %v1583_v48 = vld [vmem:[#allocation2 + $0xd0] sm:$0xff]  ;;  %v1584_v49 = vld [vmem:[#allocation2 + $0xd8] sm:$0xff]  ;;  %v1585_v54 = vld [vmem:[#allocation2 + $0xe0] sm:$0xff] }
 0x201   : > { %2473 = vst [vmem:[%s3569_s4] sm:$0xff] %v2472_v40   ;;  %2629 = vst [vmem:[%s3569_s4 + $0x8] sm:$0xff] %v2477_v46   ;;  %v1771_v61 = vmax.f32 %v1707_v52, 0.0  ;;  %v1772_v1 = vmax.f32 %v1708_v57, 0.0  ;;  %v1711_v2 = vadd.f32 %v3332_v11, %v1640_v58  ;;  %v1712_v3 = vadd.f32 %v3332_v11, %v1641_v59 }
 0x202   : > { %2630 = vst [vmem:[%s3569_s4 + $0x10] sm:$0xff] %v2482_v51   ;;  %2631 = vst [vmem:[%s3569_s4 + $0x18] sm:$0xff] %v2487_v56   ;;  %v1773_v6 = vmax.f32 %v1709_v62, 0.0  ;;  %v1774_v7 = vmax.f32 %v1710_v63, 0.0  ;;  %v1713_v9 = vadd.f32 %v3332_v11, %v1642_v0  ;;  %v1644_v10 = vmul.f32 %v3328_v8, %v1573_v60  ;;  %v1587_v60 = vld [vmem:[#allocation2 + $0xf0] sm:$0xff] }
 0x203   : > { %v2492_v14 = vpack.c.bf16 %v1772_v1, %v1771_v61  ;;  %v1775_v15 = vmax.f32 %v1711_v2, 0.0  ;;  %v1776_v16 = vmax.f32 %v1712_v3, 0.0  ;;  %v1714_v17 = vadd.f32 %v3332_v11, %v1643_v4  ;;  %v1588_v1 = vld [vmem:[#allocation2 + $0xf8] sm:$0xff] }
 0x204   : > { %v2497_v20 = vpack.c.bf16 %v1774_v7, %v1773_v6  ;;  %v1777_v21 = vmax.f32 %v1713_v9, 0.0  ;;  %v1645_v22 = vmul.f32 %v3328_v8, %v1574_v5  ;;  %v1715_v23 = vadd.f32 %v3332_v11, %v1644_v10  ;;  %v1589_v6 = vld [vmem:[#allocation2 + $0x100] sm:$0xff] }
 0x205   : > { %2632 = vst [vmem:[%s3569_s4 + $0x20] sm:$0xff] %v2492_v14   ;;  %v2502_v25 = vpack.c.bf16 %v1776_v16, %v1775_v15  ;;  %v1778_v26 = vmax.f32 %v1714_v17, 0.0  ;;  %v1646_v27 = vmul.f32 %v3328_v8, %v1575_v12  ;;  %v1647_v28 = vmul.f32 %v3328_v8, %v1576_v13  ;;  %v1590_v17 = vld [vmem:[#allocation2 + $0x108] sm:$0xff] }
 0x206   : > { %2633 = vst [vmem:[%s3569_s4 + $0x28] sm:$0xff] %v2497_v20   ;;  %v1716_v30 = vadd.f32 %v3332_v11, %v1645_v22  ;;  %v1779_v31 = vmax.f32 %v1715_v23, 0.0  ;;  %v1648_v32 = vmul.f32 %v3328_v8, %v1577_v18  ;;  %v1649_v33 = vmul.f32 %v3328_v8, %v1578_v19  ;;  %v1591_v22 = vld [vmem:[#allocation2 + $0x110] sm:$0xff]  ;;  %v1592_v23 = vld [vmem:[#allocation2 + $0x118] sm:$0xff] }
 0x207   : > { %2634 = vst [vmem:[%s3569_s4 + $0x30] sm:$0xff] %v2502_v25   ;;  %v2507_v35 = vpack.c.bf16 %v1778_v26, %v1777_v21  ;;  %v1717_v36 = vadd.f32 %v3332_v11, %v1646_v27  ;;  %v1718_v37 = vadd.f32 %v3332_v11, %v1647_v28  ;;  %v1650_v38 = vmul.f32 %v3328_v8, %v1579_v24  ;;  %v1593_v28 = vld [vmem:[#allocation2 + $0x120] sm:$0xff] }
 0x208   : > { %v1780_v39 = vmax.f32 %v1716_v30, 0.0  ;;  %v1719_v40 = vadd.f32 %v3332_v11, %v1648_v32  ;;  %v1720_v41 = vadd.f32 %v3332_v11, %v1649_v33  ;;  %v1651_v42 = vmul.f32 %v3328_v8, %v1580_v29  ;;  %v1594_v29 = vld [vmem:[#allocation2 + $0x128] sm:$0xff] }
 0x209   : > { %2635 = vst [vmem:[%s3569_s4 + $0x38] sm:$0xff] %v2507_v35   ;;  %v1781_v44 = vmax.f32 %v1717_v36, 0.0  ;;  %v1782_v45 = vmax.f32 %v1718_v37, 0.0  ;;  %v1721_v46 = vadd.f32 %v3332_v11, %v1650_v38  ;;  %v1652_v47 = vmul.f32 %v3328_v8, %v1581_v34  ;;  %v1595_v34 = vld [vmem:[#allocation2 + $0x130] sm:$0xff] }
 0x20a   : > { %v2512_v50 = vpack.c.bf16 %v1780_v39, %v1779_v31  ;;  %v1783_v51 = vmax.f32 %v1719_v40, 0.0  ;;  %v1784_v52 = vmax.f32 %v1720_v41, 0.0  ;;  %v1722_v53 = vadd.f32 %v3332_v11, %v1651_v42  ;;  %v1596_v39 = vld [vmem:[#allocation2 + $0x138] sm:$0xff] }
 0x20b   : > { %v2517_v56 = vpack.c.bf16 %v1782_v45, %v1781_v44  ;;  %v1785_v57 = vmax.f32 %v1721_v46, 0.0  ;;  %v1653_v58 = vmul.f32 %v3328_v8, %v1582_v43  ;;  %v1723_v59 = vadd.f32 %v3332_v11, %v1652_v47  ;;  %v1597_v44 = vld [vmem:[#allocation2 + $0x140] sm:$0xff] }
 0x20c   : > { %2636 = vst [vmem:[%s3569_s4 + $0x40] sm:$0xff] %v2512_v50   ;;  %v2522_v61 = vpack.c.bf16 %v1784_v52, %v1783_v51  ;;  %v1786_v62 = vmax.f32 %v1722_v53, 0.0  ;;  %v1654_v63 = vmul.f32 %v3328_v8, %v1583_v48  ;;  %v1655_v0 = vmul.f32 %v3328_v8, %v1584_v49  ;;  %v1598_v53 = vld [vmem:[#allocation2 + $0x148] sm:$0xff] }
 0x20d   : > { %2637 = vst [vmem:[%s3569_s4 + $0x48] sm:$0xff] %v2517_v56   ;;  %v1724_v2 = vadd.f32 %v3332_v11, %v1653_v58  ;;  %v1787_v3 = vmax.f32 %v1723_v59, 0.0  ;;  %v1656_v4 = vmul.f32 %v3328_v8, %v1585_v54  ;;  %v1657_v5 = vmul.f32 %v3328_v8, %v1586_v55  ;;  %v1599_v58 = vld [vmem:[#allocation2 + $0x150] sm:$0xff]  ;;  %v1600_v59 = vld [vmem:[#allocation2 + $0x158] sm:$0xff] }
 0x20e   : > { %2638 = vst [vmem:[%s3569_s4 + $0x50] sm:$0xff] %v2522_v61   ;;  %v2527_v7 = vpack.c.bf16 %v1786_v62, %v1785_v57  ;;  %v1725_v9 = vadd.f32 %v3332_v11, %v1654_v63  ;;  %v1726_v10 = vadd.f32 %v3332_v11, %v1655_v0  ;;  %v1658_v12 = vmul.f32 %v3328_v8, %v1587_v60  ;;  %v1601_v0 = vld [vmem:[#allocation2 + $0x160] sm:$0xff] }
 0x20f   : > { %v1788_v13 = vmax.f32 %v1724_v2, 0.0  ;;  %v1727_v14 = vadd.f32 %v3332_v11, %v1656_v4  ;;  %v1728_v15 = vadd.f32 %v3332_v11, %v1657_v5  ;;  %v1659_v16 = vmul.f32 %v3328_v8, %v1588_v1  ;;  %v1602_v1 = vld [vmem:[#allocation2 + $0x168] sm:$0xff] }
 0x210   : > { %2639 = vst [vmem:[%s3569_s4 + $0x58] sm:$0xff] %v2527_v7   ;;  %v1789_v18 = vmax.f32 %v1725_v9, 0.0  ;;  %v1790_v19 = vmax.f32 %v1726_v10, 0.0  ;;  %v1729_v20 = vadd.f32 %v3332_v11, %v1658_v12  ;;  %v1660_v21 = vmul.f32 %v3328_v8, %v1589_v6  ;;  %v1603_v6 = vld [vmem:[#allocation2 + $0x170] sm:$0xff] }
 0x211   : > { %v2532_v24 = vpack.c.bf16 %v1788_v13, %v1787_v3  ;;  %v1791_v25 = vmax.f32 %v1727_v14, 0.0  ;;  %v1792_v26 = vmax.f32 %v1728_v15, 0.0  ;;  %v1730_v27 = vadd.f32 %v3332_v11, %v1659_v16  ;;  %v1604_v13 = vld [vmem:[#allocation2 + $0x178] sm:$0xff] }
 0x212   : > { %v2537_v30 = vpack.c.bf16 %v1790_v19, %v1789_v18  ;;  %v1793_v31 = vmax.f32 %v1729_v20, 0.0  ;;  %v1661_v32 = vmul.f32 %v3328_v8, %v1590_v17  ;;  %v1731_v33 = vadd.f32 %v3332_v11, %v1660_v21  ;;  %v1605_v18 = vld [vmem:[#allocation2 + $0x180] sm:$0xff] }
 0x213   : > { %2640 = vst [vmem:[%s3569_s4 + $0x60] sm:$0xff] %v2532_v24   ;;  %v2542_v35 = vpack.c.bf16 %v1792_v26, %v1791_v25  ;;  %v1794_v36 = vmax.f32 %v1730_v27, 0.0  ;;  %v1662_v37 = vmul.f32 %v3328_v8, %v1591_v22  ;;  %v1663_v38 = vmul.f32 %v3328_v8, %v1592_v23  ;;  %v1606_v27 = vld [vmem:[#allocation2 + $0x188] sm:$0xff] }
 0x214   : > { %2641 = vst [vmem:[%s3569_s4 + $0x68] sm:$0xff] %v2537_v30   ;;  %v1732_v40 = vadd.f32 %v3332_v11, %v1661_v32  ;;  %v1795_v41 = vmax.f32 %v1731_v33, 0.0  ;;  %v1664_v42 = vmul.f32 %v3328_v8, %v1593_v28  ;;  %v1665_v43 = vmul.f32 %v3328_v8, %v1594_v29  ;;  %v1607_v32 = vld [vmem:[#allocation2 + $0x190] sm:$0xff]  ;;  %v1608_v33 = vld [vmem:[#allocation2 + $0x198] sm:$0xff] }
 0x215   : > { %2642 = vst [vmem:[%s3569_s4 + $0x70] sm:$0xff] %v2542_v35   ;;  %v2547_v45 = vpack.c.bf16 %v1794_v36, %v1793_v31  ;;  %v1733_v46 = vadd.f32 %v3332_v11, %v1662_v37  ;;  %v1734_v47 = vadd.f32 %v3332_v11, %v1663_v38  ;;  %v1666_v48 = vmul.f32 %v3328_v8, %v1595_v34  ;;  %v1609_v38 = vld [vmem:[#allocation2 + $0x1a0] sm:$0xff] }
 0x216   : > { %v1796_v49 = vmax.f32 %v1732_v40, 0.0  ;;  %v1735_v50 = vadd.f32 %v3332_v11, %v1664_v42  ;;  %v1736_v51 = vadd.f32 %v3332_v11, %v1665_v43  ;;  %v1667_v52 = vmul.f32 %v3328_v8, %v1596_v39  ;;  %v1610_v39 = vld [vmem:[#allocation2 + $0x1a8] sm:$0xff] }
 0x217   : > { %2643 = vst [vmem:[%s3569_s4 + $0x78] sm:$0xff] %v2547_v45   ;;  %v1797_v54 = vmax.f32 %v1733_v46, 0.0  ;;  %v1798_v55 = vmax.f32 %v1734_v47, 0.0  ;;  %v1737_v56 = vadd.f32 %v3332_v11, %v1666_v48  ;;  %v1668_v57 = vmul.f32 %v3328_v8, %v1597_v44  ;;  %v1611_v44 = vld [vmem:[#allocation2 + $0x1b0] sm:$0xff] }
 0x218   : > { %v2552_v60 = vpack.c.bf16 %v1796_v49, %v1795_v41  ;;  %v1799_v61 = vmax.f32 %v1735_v50, 0.0  ;;  %v1800_v62 = vmax.f32 %v1736_v51, 0.0  ;;  %v1738_v63 = vadd.f32 %v3332_v11, %v1667_v52  ;;  %v1612_v49 = vld [vmem:[#allocation2 + $0x1b8] sm:$0xff] }
 0x219   : > { %v2557_v2 = vpack.c.bf16 %v1798_v55, %v1797_v54  ;;  %v1801_v3 = vmax.f32 %v1737_v56, 0.0  ;;  %v1669_v4 = vmul.f32 %v3328_v8, %v1598_v53  ;;  %v1739_v5 = vadd.f32 %v3332_v11, %v1668_v57  ;;  %v1613_v54 = vld [vmem:[#allocation2 + $0x1c0] sm:$0xff] }
 0x21a   : > { %2644 = vst [vmem:[%s3569_s4 + $0x80] sm:$0xff] %v2552_v60   ;;  %v2562_v7 = vpack.c.bf16 %v1800_v62, %v1799_v61  ;;  %v1802_v9 = vmax.f32 %v1738_v63, 0.0  ;;  %v1670_v10 = vmul.f32 %v3328_v8, %v1599_v58  ;;  %v1671_v12 = vmul.f32 %v3328_v8, %v1600_v59  ;;  %v1614_v63 = vld [vmem:[#allocation2 + $0x1c8] sm:$0xff] }
 0x21b   : > { %2645 = vst [vmem:[%s3569_s4 + $0x88] sm:$0xff] %v2557_v2   ;;  %v1740_v14 = vadd.f32 %v3332_v11, %v1669_v4  ;;  %v1803_v15 = vmax.f32 %v1739_v5, 0.0  ;;  %v1672_v16 = vmul.f32 %v3328_v8, %v1601_v0  ;;  %v1673_v17 = vmul.f32 %v3328_v8, %v1602_v1  ;;  %v1615_v4 = vld [vmem:[#allocation2 + $0x1d0] sm:$0xff]  ;;  %v1616_v5 = vld [vmem:[#allocation2 + $0x1d8] sm:$0xff] }
 0x21c   : > { %2646 = vst [vmem:[%s3569_s4 + $0x90] sm:$0xff] %v2562_v7   ;;  %v2567_v19 = vpack.c.bf16 %v1802_v9, %v1801_v3  ;;  %v1741_v20 = vadd.f32 %v3332_v11, %v1670_v10  ;;  %v1742_v21 = vadd.f32 %v3332_v11, %v1671_v12  ;;  %v1674_v22 = vmul.f32 %v3328_v8, %v1603_v6  ;;  %v1617_v12 = vld [vmem:[#allocation2 + $0x1e0] sm:$0xff] }
 0x21d   : > { %v1804_v23 = vmax.f32 %v1740_v14, 0.0  ;;  %v1743_v24 = vadd.f32 %v3332_v11, %v1672_v16  ;;  %v1744_v25 = vadd.f32 %v3332_v11, %v1673_v17  ;;  %v1675_v26 = vmul.f32 %v3328_v8, %v1604_v13  ;;  %v1618_v13 = vld [vmem:[#allocation2 + $0x1e8] sm:$0xff] }
 0x21e   : > { %2647 = vst [vmem:[%s3569_s4 + $0x98] sm:$0xff] %v2567_v19   ;;  %v1805_v28 = vmax.f32 %v1741_v20, 0.0  ;;  %v1806_v29 = vmax.f32 %v1742_v21, 0.0  ;;  %v1745_v30 = vadd.f32 %v3332_v11, %v1674_v22  ;;  %v1676_v31 = vmul.f32 %v3328_v8, %v1605_v18  ;;  %v1619_v18 = vld [vmem:[#allocation2 + $0x1f0] sm:$0xff] }
 0x21f   : > { %v2572_v34 = vpack.c.bf16 %v1804_v23, %v1803_v15  ;;  %v1807_v35 = vmax.f32 %v1743_v24, 0.0  ;;  %v1808_v36 = vmax.f32 %v1744_v25, 0.0  ;;  %v1746_v37 = vadd.f32 %v3332_v11, %v1675_v26  ;;  %v1620_v23 = vld [vmem:[#allocation2 + $0x1f8] sm:$0xff] }
 0x220   : > { %v2577_v40 = vpack.c.bf16 %v1806_v29, %v1805_v28  ;;  %v1809_v41 = vmax.f32 %v1745_v30, 0.0  ;;  %v1677_v42 = vmul.f32 %v3328_v8, %v1606_v27  ;;  %v1747_v43 = vadd.f32 %v3332_v11, %v1676_v31 }
 0x221   : > { %2648 = vst [vmem:[%s3569_s4 + $0xa0] sm:$0xff] %v2572_v34   ;;  %v2582_v45 = vpack.c.bf16 %v1808_v36, %v1807_v35  ;;  %v1810_v46 = vmax.f32 %v1746_v37, 0.0  ;;  %v1678_v47 = vmul.f32 %v3328_v8, %v1607_v32  ;;  %v1679_v48 = vmul.f32 %v3328_v8, %v1608_v33 }
 0x222   : > { %2649 = vst [vmem:[%s3569_s4 + $0xa8] sm:$0xff] %v2577_v40   ;;  %v1748_v50 = vadd.f32 %v3332_v11, %v1677_v42  ;;  %v1811_v51 = vmax.f32 %v1747_v43, 0.0  ;;  %v1680_v52 = vmul.f32 %v3328_v8, %v1609_v38  ;;  %v1681_v53 = vmul.f32 %v3328_v8, %v1610_v39 }
 0x223   : > { %2650 = vst [vmem:[%s3569_s4 + $0xb0] sm:$0xff] %v2582_v45   ;;  %v2587_v55 = vpack.c.bf16 %v1810_v46, %v1809_v41  ;;  %v1749_v56 = vadd.f32 %v3332_v11, %v1678_v47  ;;  %v1750_v57 = vadd.f32 %v3332_v11, %v1679_v48  ;;  %v1682_v58 = vmul.f32 %v3328_v8, %v1611_v44 }
 0x224   : > { %v1812_v59 = vmax.f32 %v1748_v50, 0.0  ;;  %v1751_v60 = vadd.f32 %v3332_v11, %v1680_v52  ;;  %v1752_v61 = vadd.f32 %v3332_v11, %v1681_v53  ;;  %v1683_v62 = vmul.f32 %v3328_v8, %v1612_v49 }
 0x225   : > { %2651 = vst [vmem:[%s3569_s4 + $0xb8] sm:$0xff] %v2587_v55   ;;  %v1813_v0 = vmax.f32 %v1749_v56, 0.0  ;;  %v1814_v1 = vmax.f32 %v1750_v57, 0.0  ;;  %v1753_v2 = vadd.f32 %v3332_v11, %v1682_v58  ;;  %v1684_v3 = vmul.f32 %v3328_v8, %v1613_v54 }
 0x226   : > { %v2592_v6 = vpack.c.bf16 %v1812_v59, %v1811_v51  ;;  %v1815_v7 = vmax.f32 %v1751_v60, 0.0  ;;  %v1816_v9 = vmax.f32 %v1752_v61, 0.0  ;;  %v1754_v10 = vadd.f32 %v3332_v11, %v1683_v62 }
 0x227   : > { %v2597_v14 = vpack.c.bf16 %v1814_v1, %v1813_v0  ;;  %v1817_v15 = vmax.f32 %v1753_v2, 0.0  ;;  %v1685_v16 = vmul.f32 %v3328_v8, %v1614_v63  ;;  %v1755_v17 = vadd.f32 %v3332_v11, %v1684_v3 }
 0x228   : > { %2652 = vst [vmem:[%s3569_s4 + $0xc0] sm:$0xff] %v2592_v6   ;;  %v2602_v19 = vpack.c.bf16 %v1816_v9, %v1815_v7  ;;  %v1818_v20 = vmax.f32 %v1754_v10, 0.0  ;;  %v1686_v21 = vmul.f32 %v3328_v8, %v1615_v4  ;;  %v1687_v22 = vmul.f32 %v3328_v8, %v1616_v5 }
 0x229   : > { %2653 = vst [vmem:[%s3569_s4 + $0xc8] sm:$0xff] %v2597_v14   ;;  %v1756_v24 = vadd.f32 %v3332_v11, %v1685_v16  ;;  %v1819_v25 = vmax.f32 %v1755_v17, 0.0  ;;  %v1688_v26 = vmul.f32 %v3328_v8, %v1617_v12  ;;  %v1689_v27 = vmul.f32 %v3328_v8, %v1618_v13 }
 0x22a   : > { %2654 = vst [vmem:[%s3569_s4 + $0xd0] sm:$0xff] %v2602_v19   ;;  %v2607_v28 = vpack.c.bf16 %v1818_v20, %v1817_v15  ;;  %v1757_v29 = vadd.f32 %v3332_v11, %v1686_v21  ;;  %v1758_v30 = vadd.f32 %v3332_v11, %v1687_v22  ;;  %v1690_v31 = vmul.f32 %v3328_v8, %v1619_v18 }
 0x22b   : > { %v1820_v32 = vmax.f32 %v1756_v24, 0.0  ;;  %v1759_v33 = vadd.f32 %v3332_v11, %v1688_v26  ;;  %v1760_v34 = vadd.f32 %v3332_v11, %v1689_v27  ;;  %v1691_v35 = vmul.f32 %v3328_v8, %v1620_v23 }
 0x22c   : > { %2655 = vst [vmem:[%s3569_s4 + $0xd8] sm:$0xff] %v2607_v28   ;;  %v1821_v36 = vmax.f32 %v1757_v29, 0.0  ;;  %v1822_v37 = vmax.f32 %v1758_v30, 0.0  ;;  %v1761_v38 = vadd.f32 %v3332_v11, %v1690_v31 }
 0x22d   : > { %v2612_v39 = vpack.c.bf16 %v1820_v32, %v1819_v25  ;;  %v1823_v40 = vmax.f32 %v1759_v33, 0.0  ;;  %v1824_v41 = vmax.f32 %v1760_v34, 0.0  ;;  %v1762_v42 = vadd.f32 %v3332_v11, %v1691_v35 }
 0x22e   : > { %v2617_v43 = vpack.c.bf16 %v1822_v37, %v1821_v36  ;;  %v1825_v44 = vmax.f32 %v1761_v38, 0.0 }
 0x22f   : > { %2656 = vst [vmem:[%s3569_s4 + $0xe0] sm:$0xff] %v2612_v39   ;;  %v2622_v8 = vpack.c.bf16 %v1824_v41, %v1823_v40  ;;  %v1826_v45 = vmax.f32 %v1762_v42, 0.0 }
 0x230   : > { %2657 = vst [vmem:[%s3569_s4 + $0xe8] sm:$0xff] %v2617_v43  }
 0x231   : > { %2658 = vst [vmem:[%s3569_s4 + $0xf0] sm:$0xff] %v2622_v8   ;;  %v2627_v46 = vpack.c.bf16 %v1826_v45, %v1825_v44 }
 0x233   : > { %2659 = vst [vmem:[%s3569_s4 + $0xf8] sm:$0xff] %v2627_v46  }
 0x234 PF: > { %s14_s17 = sadd.s32 1, %s2887_s17   ;;  %s3570_s15 = smov %s2883_s16 }
 0x235   : > { %p11_p6 = scmp.ge.s32.totalorder %s14_s17, 4   ;;  %s3571_s16 = smov %s3573_s18 }
 0x237   :  { %13 = sbr.rel (!%p11_p6) target bundleno = 2 (0x2), region = 95 }

</bundles_post_ra>
